<compile_context>
chip_gen: v7x
topology: tpu7x:2x2x1
jax: 0.10.0
libtpu: 0.0.40
codegen_flags: <defaults>
</compile_context>

<pallas_src>
import functools

import jax
import jax.numpy as jnp
from jax import lax
from jax.experimental import pallas as pl
from jax.experimental.pallas import tpu as pltpu


# ---------------------------------------------------------------------------
# Fused conv1 -> ReLU -> conv2 -> ReLU -> MaxPool(2,2) kernel (one image/step)
# ---------------------------------------------------------------------------
def _fused_cnn_kernel(xp_ref, w1_ref, b1_ref, w2_ref, b2_ref, out_ref,
                      y1_scr, patch_scr, *, H, W):
    # xp_ref:    (Hp, 2, Wq, 9)  bf16  im2col of the 1-channel input on the
    #                                  zero-padded raster, even/odd columns
    #                                  de-interleaved (parity, q).
    # w1_ref:    (9, 64)    bf16       conv1 weights, rows ordered (kh, kw).
    # b1_ref:    (1, 64)    f32
    # w2_ref:    (576, 32)  bf16       conv2 weights, rows ordered (kh, kw, cin).
    # b2_ref:    (1, 32)    f32
    # out_ref:   (H2, W2, 32) f32      pooled output for this image.
    # y1_scr:    (Hp, 2, Wq, 64) bf16  conv1 output on the padded raster.
    # patch_scr: (4*W2, 576) bf16      conv2 im2col tile for one pooled row.
    Hp = H + 2
    H2, W2 = H // 2, W // 2
    Wq = W2 + 1                      # = (W + 2) // 2

    # ---- stage 1: conv1 (1 -> 64) + bias + ReLU into the padded scratch ----
    def conv1_row(i, carry):
        valid_row = jnp.logical_and(i >= 1, i <= H)
        q = lax.broadcasted_iota(jnp.int32, (Wq, 1), 0)
        for par in range(2):
            y = jnp.dot(xp_ref[i, par], w1_ref[...],
                        preferred_element_type=jnp.float32) + b1_ref[...]
            y = jnp.maximum(y, 0.0)
            # zero the padding positions of the padded raster (conv2's pad=1)
            col_ok = (q >= 1) if par == 0 else (q <= W2 - 1)
            y = jnp.where(jnp.logical_and(valid_row, col_ok), y, 0.0)
            y1_scr[i, par] = y.astype(jnp.bfloat16)
        return carry

    lax.fori_loop(0, Hp, conv1_row, 0)

    # ---- stage 2: conv2 (64 -> 32) + bias + ReLU + 2x2 max-pool -------------
    def pool_row(h2, carry):
        # 4 conv-input rows (2 output rows + halo) x even/odd columns
        rows = [[y1_scr[2 * h2 + k, par] for par in range(2)] for k in range(4)]
        # per row: columns q in [0, W2) ("A") and q in [1, W2 + 1) ("B")
        sl = [[(r[0:W2, :], r[1:W2 + 1, :]) for r in rp] for rp in rows]

        # Assemble the im2col patches for the four conv outputs feeding this
        # pooled row: (output-row offset rsub, output-column parity) x 9 taps.
        for blk, (rsub, parity) in enumerate([(0, 0), (0, 1), (1, 0), (1, 1)]):
            for dh in range(3):
                a0, b0 = sl[rsub + dh][0]
                a1, b1v = sl[rsub + dh][1]
                taps = (a0, a1, b0) if parity == 0 else (a1, b0, b1v)
                for dw in range(3):
                    t = dh * 3 + dw
                    patch_scr[blk * W2:(blk + 1) * W2,
                              t * 64:(t + 1) * 64] = taps[dw]

        acc = jnp.dot(patch_scr[...], w2_ref[...],
                      preferred_element_type=jnp.float32)          # (4*W2, 32)
        m = jnp.maximum(jnp.maximum(acc[0:W2], acc[W2:2 * W2]),
                        jnp.maximum(acc[2 * W2:3 * W2], acc[3 * W2:4 * W2]))
        out_ref[h2] = jnp.maximum(m + b2_ref[...], 0.0).astype(out_ref.dtype)
        return carry

    lax.fori_loop(0, H2, pool_row, 0)


def fused_conv_pool(xp, w1, b1, w2, b2, *, N, H, W):
    Hp, H2, W2 = H + 2, H // 2, W // 2
    Wq = W2 + 1
    kernel = functools.partial(_fused_cnn_kernel, H=H, W=W)
    flops = 2 * N * H * W * (9 * 1 * 64 + 9 * 64 * 32)
    bytes_accessed = int(xp.size * 2 + N * H2 * W2 * 32 * 4
                         + (9 * 64 + 576 * 32) * 2 + (64 + 32) * 4)
    return pl.pallas_call(
        kernel,
        out_shape=jax.ShapeDtypeStruct((N, H2, W2, 32), jnp.float32),
        grid=(N,),
        in_specs=[
            pl.BlockSpec((None, Hp, 2, Wq, 9), lambda n: (n, 0, 0, 0, 0)),
            pl.BlockSpec((9, 64), lambda n: (0, 0)),
            pl.BlockSpec((1, 64), lambda n: (0, 0)),
            pl.BlockSpec((576, 32), lambda n: (0, 0)),
            pl.BlockSpec((1, 32), lambda n: (0, 0)),
        ],
        out_specs=pl.BlockSpec((None, H2, W2, 32), lambda n: (n, 0, 0, 0)),
        scratch_shapes=[
            pltpu.VMEM((Hp, 2, Wq, 64), jnp.bfloat16),
            pltpu.VMEM((4 * W2, 576), jnp.bfloat16),
        ],
        compiler_params=pltpu.CompilerParams(
            dimension_semantics=("parallel",),
            vmem_limit_bytes=48 * 1024 * 1024),
        cost_estimate=pl.CostEstimate(flops=flops, transcendentals=0,
                                      bytes_accessed=bytes_accessed),
    )(xp, w1, b1, w2, b2)


# ---------------------------------------------------------------------------
# fc1: reduction-tiled matmul + bias, accumulating into the resident output
# ---------------------------------------------------------------------------
def _fc_kernel(x_ref, w_ref, b_ref, o_ref):
    @pl.when(pl.program_id(0) == 0)
    def _():
        o_ref[...] = jnp.broadcast_to(b_ref[...], o_ref.shape)

    o_ref[...] += jnp.dot(x_ref[...], w_ref[...],
                          preferred_element_type=jnp.float32)


def fc_layer(flat, wfc, bfc, *, chunk):
    N, F = flat.shape
    _, C = wfc.shape
    assert F % chunk == 0
    return pl.pallas_call(
        _fc_kernel,
        out_shape=jax.ShapeDtypeStruct((N, C), jnp.float32),
        grid=(F // chunk,),
        in_specs=[
            pl.BlockSpec((N, chunk), lambda k: (0, k)),
            pl.BlockSpec((chunk, C), lambda k: (k, 0)),
            pl.BlockSpec((1, C), lambda k: (0, 0)),
        ],
        out_specs=pl.BlockSpec((N, C), lambda k: (0, 0)),
        compiler_params=pltpu.CompilerParams(
            dimension_semantics=("arbitrary",)),
    )(flat, wfc, bfc.reshape(1, C))


# ---------------------------------------------------------------------------
# Parameter creation / packing (PyTorch layout -> kernel layout)
# ---------------------------------------------------------------------------
def init_torch_params(key, num_classes, H, W):
    H2, W2 = H // 2, W // 2
    ks = jax.random.split(key, 6)
    return {
        "conv1_w": 0.05 * jax.random.normal(ks[0], (64, 1, 3, 3), jnp.float32),
        "conv1_b": 0.05 * jax.random.normal(ks[1], (64,), jnp.float32),
        "conv2_w": 0.05 * jax.random.normal(ks[2], (32, 64, 3, 3), jnp.float32),
        "conv2_b": 0.05 * jax.random.normal(ks[3], (32,), jnp.float32),
        "fc_w": 0.05 * jax.random.normal(ks[4], (num_classes, 32 * H2 * W2),
                                         jnp.float32),
        "fc_b": 0.05 * jax.random.normal(ks[5], (num_classes,), jnp.float32),
    }


def pack_params(tp, H, W):
    """PyTorch-layout f32 params -> kernel-layout bf16 weights / f32 biases."""
    H2, W2 = H // 2, W // 2
    num_classes = tp["fc_w"].shape[0]
    w1 = jnp.transpose(tp["conv1_w"], (2, 3, 1, 0)).reshape(9, 64)
    w2 = jnp.transpose(tp["conv2_w"], (2, 3, 1, 0)).reshape(9 * 64, 32)
    # fc weight columns permuted from NCHW-flatten to NHWC-flatten order so the
    # kernel output needs no transpose before the Linear layer.
    wfc = (tp["fc_w"].reshape(num_classes, 32, H2, W2)
           .transpose(0, 2, 3, 1).reshape(num_classes, H2 * W2 * 32).T)
    return {
        "w1": w1.astype(jnp.bfloat16), "b1": tp["conv1_b"].reshape(1, 64),
        "w2": w2.astype(jnp.bfloat16), "b2": tp["conv2_b"].reshape(1, 32),
        "wfc": wfc.astype(jnp.bfloat16), "bfc": tp["fc_b"],
    }


# ---------------------------------------------------------------------------
# Forward pass
# ---------------------------------------------------------------------------
@jax.jit
def simple_cnn_forward(x_nchw, kp):
    n, cin, h, w = x_nchw.shape
    assert cin == 1 and h % 2 == 0 and w % 8 == 0
    Hp, Wp = h + 2, w + 2
    H2, W2 = h // 2, w // 2
    Wq = W2 + 1

    # Glue: 3x3 im2col of the single input channel, laid out on the padded
    # output raster and de-interleaved into even/odd columns (this is what lets
    # the kernel fuse the 2x2 max-pool using only contiguous static slices).
    x = x_nchw[:, 0]                                       # (N, H, W)
    xpad = jnp.pad(x, ((0, 0), (2, 2), (2, 2)))
    cols = [xpad[:, kh:kh + Hp, kw:kw + Wp]
            for kh in range(3) for kw in range(3)]
    xp = jnp.stack(cols, axis=-1)                          # (N, Hp, Wp, 9)
    xp = xp.reshape(n, Hp, Wq, 2, 9).transpose(0, 1, 3, 2, 4)  # (N, Hp, 2, Wq, 9)
    xp = xp.astype(jnp.bfloat16)

    pooled = fused_conv_pool(xp, kp["w1"], kp["b1"], kp["w2"], kp["b2"],
                             N=n, H=h, W=w)                # (N, H2, W2, 32) f32

    flat = pooled.reshape(n, H2 * W2 * 32).astype(jnp.bfloat16)
    return fc_layer(flat, kp["wfc"], kp["bfc"], chunk=W2 * 32)


# ---------------------------------------------------------------------------
# Pure-JAX reference (PyTorch semantics) for a numerical sanity check
# ---------------------------------------------------------------------------
def reference_forward(x_nchw, tp):
    dn = ("NCHW", "OIHW", "NCHW")
    y = lax.conv_general_dilated(x_nchw, tp["conv1_w"], (1, 1),
                                 ((1, 1), (1, 1)), dimension_numbers=dn)
    y = jnp.maximum(y + tp["conv1_b"][None, :, None, None], 0.0)
    y = lax.conv_general_dilated(y, tp["conv2_w"], (1, 1),
                                 ((1, 1), (1, 1)), dimension_numbers=dn)
    y = jnp.maximum(y + tp["conv2_b"][None, :, None, None], 0.0)
    n, c, h, w = y.shape
    y = y.reshape(n, c, h // 2, 2, w // 2, 2).max(axis=(3, 5))
    flat = y.reshape(n, -1)
    return flat @ tp["fc_w"].T + tp["fc_b"]


if __name__ == "__main__":
    key = jax.random.PRNGKey(0)
    k_x, k_p = jax.random.split(key)
    # Small shapes consistent with the module (original expects 320x240 input;
    # here spatial = 16 so fc1 sees 32 * 8 * 8 features).
    N, H, W, NUM_CLASSES = 2, 16, 16, 2
    x = jax.random.normal(k_x, (N, 1, H, W), jnp.float32)   # NCHW like PyTorch

    torch_params = init_torch_params(k_p, NUM_CLASSES, H, W)
    params = pack_params(torch_params, H, W)

    out = jax.block_until_ready(simple_cnn_forward(x, params))
    assert out.shape == (N, NUM_CLASSES) and out.dtype == jnp.float32

    # Numerical sanity check vs. pure-JAX reference (kernel uses bf16 weights /
    # activations with f32 accumulation -> loose tolerance).
    ref = reference_forward(x, torch_params)
    max_err = float(jnp.max(jnp.abs(out - ref)))
    assert max_err < 5e-2, f"kernel deviates from reference: max|diff|={max_err}"
    print("KERNEL_OK")
</pallas_src>

<mosaic_0001>
module attributes {stable_mosaic.version = 11 : i64} {
  func.func @_fused_cnn_kernel(%arg0: i32, %arg1: memref<1x18x2x9x9xbf16, #tpu.memory_space<vmem>>, %arg2: memref<9x64xbf16, #tpu.memory_space<vmem>>, %arg3: memref<1x64xf32, #tpu.memory_space<vmem>>, %arg4: memref<576x32xbf16, #tpu.memory_space<vmem>>, %arg5: memref<1x32xf32, #tpu.memory_space<vmem>>, %arg6: memref<1x8x8x32xf32, #tpu.memory_space<vmem>>, %arg7: memref<18x2x9x64xbf16, #tpu.memory_space<vmem>>, %arg8: memref<32x576xbf16, #tpu.memory_space<vmem>>) attributes {dimension_semantics = [#tpu.dimension_semantics<parallel>], iteration_bounds = array<i64: 2>, scalar_prefetch = 0 : i64, scratch_operands = 2 : i64, tpu.core_type = #tpu.core_type<tc>, window_params = [{transform_indices = @transform_0, window_bounds = array<i64: 1, 18, 2, 9, 9>}, {pipeline_mode = #tpu.pipeline_mode<synchronous>, transform_indices = @transform_1, window_bounds = array<i64: 9, 64>}, {pipeline_mode = #tpu.pipeline_mode<synchronous>, transform_indices = @transform_2, window_bounds = array<i64: 1, 64>}, {pipeline_mode = #tpu.pipeline_mode<synchronous>, transform_indices = @transform_3, window_bounds = array<i64: 576, 32>}, {pipeline_mode = #tpu.pipeline_mode<synchronous>, transform_indices = @transform_4, window_bounds = array<i64: 1, 32>}, {transform_indices = @transform_5, window_bounds = array<i64: 1, 8, 8, 32>}]} {
    %c0_i32 = arith.constant 0 : i32
    %c18_i32 = arith.constant 18 : i32
    %0 = arith.addi %c0_i32, %c18_i32 : i32
    %c1_i32 = arith.constant 1 : i32
    scf.for %arg9 = %c0_i32 to %0 step %c1_i32  : i32 {
      %c1_i32_4 = arith.constant 1 : i32
      %2 = arith.cmpi sge, %arg9, %c1_i32_4 : i32
      %c16_i32 = arith.constant 16 : i32
      %3 = arith.cmpi sle, %arg9, %c16_i32 : i32
      %4 = arith.andi %2, %3 : i1
      %5 = tpu.iota {dimensions = array<i32: 0>} : vector<9x1xi32>
      %c0 = arith.constant 0 : index
      %6 = arith.index_cast %arg9 : i32 to index
      %c0_5 = arith.constant 0 : index
      %c0_6 = arith.constant 0 : index
      %c0_7 = arith.constant 0 : index
      %7 = vector.load %arg1[%c0, %6, %c0_5, %c0_6, %c0_7] : memref<1x18x2x9x9xbf16, #tpu.memory_space<vmem>>, vector<1x1x1x9x9xbf16>
      %8 = vector.shape_cast %7 : vector<1x1x1x9x9xbf16> to vector<9x9xbf16>
      %c0_8 = arith.constant 0 : index
      %c0_9 = arith.constant 0 : index
      %9 = vector.load %arg2[%c0_8, %c0_9] : memref<9x64xbf16, #tpu.memory_space<vmem>>, vector<9x64xbf16>
      %cst = arith.constant dense<0.000000e+00> : vector<9x64xf32>
      %10 = tpu.matmul %8, %9, %cst {dimension_numbers = #tpu.dot_dimension_numbers<[1], [0], [0], [1], [0, 0, 1, 1], [], []>} : vector<9x9xbf16>, vector<9x64xbf16>, vector<9x64xf32> -> vector<9x64xf32>
      %c0_10 = arith.constant 0 : index
      %c0_11 = arith.constant 0 : index
      %11 = vector.load %arg3[%c0_10, %c0_11] : memref<1x64xf32, #tpu.memory_space<vmem>>, vector<1x64xf32>
      %12 = vector.broadcast %11 : vector<1x64xf32> to vector<9x64xf32>
      %13 = arith.addf %10, %12 : vector<9x64xf32>
      %cst_12 = arith.constant 0.000000e+00 : f32
      %14 = vector.broadcast %cst_12 : f32 to vector<9x64xf32>
      %15 = arith.maximumf %13, %14 : vector<9x64xf32>
      %c1_i32_13 = arith.constant 1 : i32
      %16 = vector.broadcast %c1_i32_13 : i32 to vector<9x1xi32>
      %17 = arith.cmpi sge, %5, %16 : vector<9x1xi32>
      %18 = vector.broadcast %4 : i1 to vector<9x1xi1>
      %19 = arith.andi %18, %17 : vector<9x1xi1>
      %cst_14 = arith.constant 0.000000e+00 : f32
      %20 = vector.shape_cast %19 : vector<9x1xi1> to vector<9x1xi1>
      %21 = vector.broadcast %20 : vector<9x1xi1> to vector<9x64xi1>
      %22 = vector.broadcast %cst_14 : f32 to vector<9x64xf32>
      %23 = arith.select %21, %15, %22 : vector<9x64xi1>, vector<9x64xf32>
      %24 = arith.truncf %23 : vector<9x64xf32> to vector<9x64xbf16>
      %25 = arith.index_cast %arg9 : i32 to index
      %c0_15 = arith.constant 0 : index
      %c0_16 = arith.constant 0 : index
      %c0_17 = arith.constant 0 : index
      %26 = vector.load %arg7[%25, %c0_15, %c0_16, %c0_17] : memref<18x2x9x64xbf16, #tpu.memory_space<vmem>>, vector<1x1x9x64xbf16>
      %27 = vector.shape_cast %26 : vector<1x1x9x64xbf16> to vector<9x64xbf16>
      %28 = vector.shape_cast %24 : vector<9x64xbf16> to vector<1x1x9x64xbf16>
      tpu.vector_store %arg7[%25, %c0_15, %c0_16, %c0_17], %28 {strides = array<i32>} : memref<18x2x9x64xbf16, #tpu.memory_space<vmem>>, vector<1x1x9x64xbf16>,
      %c0_18 = arith.constant 0 : index
      %29 = arith.index_cast %arg9 : i32 to index
      %c1 = arith.constant 1 : index
      %c0_19 = arith.constant 0 : index
      %c0_20 = arith.constant 0 : index
      %30 = vector.load %arg1[%c0_18, %29, %c1, %c0_19, %c0_20] : memref<1x18x2x9x9xbf16, #tpu.memory_space<vmem>>, vector<1x1x1x9x9xbf16>
      %31 = vector.shape_cast %30 : vector<1x1x1x9x9xbf16> to vector<9x9xbf16>
      %c0_21 = arith.constant 0 : index
      %c0_22 = arith.constant 0 : index
      %32 = vector.load %arg2[%c0_21, %c0_22] : memref<9x64xbf16, #tpu.memory_space<vmem>>, vector<9x64xbf16>
      %cst_23 = arith.constant dense<0.000000e+00> : vector<9x64xf32>
      %33 = tpu.matmul %31, %32, %cst_23 {dimension_numbers = #tpu.dot_dimension_numbers<[1], [0], [0], [1], [0, 0, 1, 1], [], []>} : vector<9x9xbf16>, vector<9x64xbf16>, vector<9x64xf32> -> vector<9x64xf32>
      %c0_24 = arith.constant 0 : index
      %c0_25 = arith.constant 0 : index
      %34 = vector.load %arg3[%c0_24, %c0_25] : memref<1x64xf32, #tpu.memory_space<vmem>>, vector<1x64xf32>
      %35 = vector.broadcast %34 : vector<1x64xf32> to vector<9x64xf32>
      %36 = arith.addf %33, %35 : vector<9x64xf32>
      %cst_26 = arith.constant 0.000000e+00 : f32
      %37 = vector.broadcast %cst_26 : f32 to vector<9x64xf32>
      %38 = arith.maximumf %36, %37 : vector<9x64xf32>
      %c7_i32 = arith.constant 7 : i32
      %39 = vector.broadcast %c7_i32 : i32 to vector<9x1xi32>
      %40 = arith.cmpi sle, %5, %39 : vector<9x1xi32>
      %41 = vector.broadcast %4 : i1 to vector<9x1xi1>
      %42 = arith.andi %41, %40 : vector<9x1xi1>
      %cst_27 = arith.constant 0.000000e+00 : f32
      %43 = vector.shape_cast %42 : vector<9x1xi1> to vector<9x1xi1>
      %44 = vector.broadcast %43 : vector<9x1xi1> to vector<9x64xi1>
      %45 = vector.broadcast %cst_27 : f32 to vector<9x64xf32>
      %46 = arith.select %44, %38, %45 : vector<9x64xi1>, vector<9x64xf32>
      %47 = arith.truncf %46 : vector<9x64xf32> to vector<9x64xbf16>
      %48 = arith.index_cast %arg9 : i32 to index
      %c1_28 = arith.constant 1 : index
      %c0_29 = arith.constant 0 : index
      %c0_30 = arith.constant 0 : index
      %49 = vector.load %arg7[%48, %c1_28, %c0_29, %c0_30] : memref<18x2x9x64xbf16, #tpu.memory_space<vmem>>, vector<1x1x9x64xbf16>
      %50 = vector.shape_cast %49 : vector<1x1x9x64xbf16> to vector<9x64xbf16>
      %51 = vector.shape_cast %47 : vector<9x64xbf16> to vector<1x1x9x64xbf16>
      tpu.vector_store %arg7[%48, %c1_28, %c0_29, %c0_30], %51 {strides = array<i32>} : memref<18x2x9x64xbf16, #tpu.memory_space<vmem>>, vector<1x1x9x64xbf16>,
    }
    %c18_i32_0 = arith.constant 18 : i32
    %c0_i32_1 = arith.constant 0 : i32
    %c8_i32 = arith.constant 8 : i32
    %1 = arith.addi %c0_i32_1, %c8_i32 : i32
    %c1_i32_2 = arith.constant 1 : i32
    scf.for %arg9 = %c0_i32_1 to %1 step %c1_i32_2  : i32 {
      %c2_i32 = arith.constant 2 : i32
      %2 = arith.muli %c2_i32, %arg9 : i32
      %c0_i32_4 = arith.constant 0 : i32
      %3 = arith.addi %2, %c0_i32_4 : i32
      %4 = arith.index_cast %3 : i32 to index
      %c0 = arith.constant 0 : index
      %c0_5 = arith.constant 0 : index
      %c0_6 = arith.constant 0 : index
      %5 = vector.load %arg7[%4, %c0, %c0_5, %c0_6] : memref<18x2x9x64xbf16, #tpu.memory_space<vmem>>, vector<1x1x9x64xbf16>
      %6 = vector.shape_cast %5 : vector<1x1x9x64xbf16> to vector<9x64xbf16>
      %c2_i32_7 = arith.constant 2 : i32
      %7 = arith.muli %c2_i32_7, %arg9 : i32
      %c0_i32_8 = arith.constant 0 : i32
      %8 = arith.addi %7, %c0_i32_8 : i32
      %9 = arith.index_cast %8 : i32 to index
      %c1 = arith.constant 1 : index
      %c0_9 = arith.constant 0 : index
      %c0_10 = arith.constant 0 : index
      %10 = vector.load %arg7[%9, %c1, %c0_9, %c0_10] : memref<18x2x9x64xbf16, #tpu.memory_space<vmem>>, vector<1x1x9x64xbf16>
      %11 = vector.shape_cast %10 : vector<1x1x9x64xbf16> to vector<9x64xbf16>
      %c2_i32_11 = arith.constant 2 : i32
      %12 = arith.muli %c2_i32_11, %arg9 : i32
      %c1_i32_12 = arith.constant 1 : i32
      %13 = arith.addi %12, %c1_i32_12 : i32
      %14 = arith.index_cast %13 : i32 to index
      %c0_13 = arith.constant 0 : index
      %c0_14 = arith.constant 0 : index
      %c0_15 = arith.constant 0 : index
      %15 = vector.load %arg7[%14, %c0_13, %c0_14, %c0_15] : memref<18x2x9x64xbf16, #tpu.memory_space<vmem>>, vector<1x1x9x64xbf16>
      %16 = vector.shape_cast %15 : vector<1x1x9x64xbf16> to vector<9x64xbf16>
      %c2_i32_16 = arith.constant 2 : i32
      %17 = arith.muli %c2_i32_16, %arg9 : i32
      %c1_i32_17 = arith.constant 1 : i32
      %18 = arith.addi %17, %c1_i32_17 : i32
      %19 = arith.index_cast %18 : i32 to index
      %c1_18 = arith.constant 1 : index
      %c0_19 = arith.constant 0 : index
      %c0_20 = arith.constant 0 : index
      %20 = vector.load %arg7[%19, %c1_18, %c0_19, %c0_20] : memref<18x2x9x64xbf16, #tpu.memory_space<vmem>>, vector<1x1x9x64xbf16>
      %21 = vector.shape_cast %20 : vector<1x1x9x64xbf16> to vector<9x64xbf16>
      %c2_i32_21 = arith.constant 2 : i32
      %22 = arith.muli %c2_i32_21, %arg9 : i32
      %c2_i32_22 = arith.constant 2 : i32
      %23 = arith.addi %22, %c2_i32_22 : i32
      %24 = arith.index_cast %23 : i32 to index
      %c0_23 = arith.constant 0 : index
      %c0_24 = arith.constant 0 : index
      %c0_25 = arith.constant 0 : index
      %25 = vector.load %arg7[%24, %c0_23, %c0_24, %c0_25] : memref<18x2x9x64xbf16, #tpu.memory_space<vmem>>, vector<1x1x9x64xbf16>
      %26 = vector.shape_cast %25 : vector<1x1x9x64xbf16> to vector<9x64xbf16>
      %c2_i32_26 = arith.constant 2 : i32
      %27 = arith.muli %c2_i32_26, %arg9 : i32
      %c2_i32_27 = arith.constant 2 : i32
      %28 = arith.addi %27, %c2_i32_27 : i32
      %29 = arith.index_cast %28 : i32 to index
      %c1_28 = arith.constant 1 : index
      %c0_29 = arith.constant 0 : index
      %c0_30 = arith.constant 0 : index
      %30 = vector.load %arg7[%29, %c1_28, %c0_29, %c0_30] : memref<18x2x9x64xbf16, #tpu.memory_space<vmem>>, vector<1x1x9x64xbf16>
      %31 = vector.shape_cast %30 : vector<1x1x9x64xbf16> to vector<9x64xbf16>
      %c2_i32_31 = arith.constant 2 : i32
      %32 = arith.muli %c2_i32_31, %arg9 : i32
      %c3_i32 = arith.constant 3 : i32
      %33 = arith.addi %32, %c3_i32 : i32
      %34 = arith.index_cast %33 : i32 to index
      %c0_32 = arith.constant 0 : index
      %c0_33 = arith.constant 0 : index
      %c0_34 = arith.constant 0 : index
      %35 = vector.load %arg7[%34, %c0_32, %c0_33, %c0_34] : memref<18x2x9x64xbf16, #tpu.memory_space<vmem>>, vector<1x1x9x64xbf16>
      %36 = vector.shape_cast %35 : vector<1x1x9x64xbf16> to vector<9x64xbf16>
      %c2_i32_35 = arith.constant 2 : i32
      %37 = arith.muli %c2_i32_35, %arg9 : i32
      %c3_i32_36 = arith.constant 3 : i32
      %38 = arith.addi %37, %c3_i32_36 : i32
      %39 = arith.index_cast %38 : i32 to index
      %c1_37 = arith.constant 1 : index
      %c0_38 = arith.constant 0 : index
      %c0_39 = arith.constant 0 : index
      %40 = vector.load %arg7[%39, %c1_37, %c0_38, %c0_39] : memref<18x2x9x64xbf16, #tpu.memory_space<vmem>>, vector<1x1x9x64xbf16>
      %41 = vector.shape_cast %40 : vector<1x1x9x64xbf16> to vector<9x64xbf16>
      %42 = vector.extract_strided_slice %6 {offsets = [0, 0], sizes = [8, 64], strides = [1, 1]} : vector<9x64xbf16> to vector<8x64xbf16>
      %43 = vector.extract_strided_slice %6 {offsets = [1, 0], sizes = [8, 64], strides = [1, 1]} : vector<9x64xbf16> to vector<8x64xbf16>
      %44 = vector.extract_strided_slice %11 {offsets = [0, 0], sizes = [8, 64], strides = [1, 1]} : vector<9x64xbf16> to vector<8x64xbf16>
      %45 = vector.extract_strided_slice %11 {offsets = [1, 0], sizes = [8, 64], strides = [1, 1]} : vector<9x64xbf16> to vector<8x64xbf16>
      %46 = vector.extract_strided_slice %16 {offsets = [0, 0], sizes = [8, 64], strides = [1, 1]} : vector<9x64xbf16> to vector<8x64xbf16>
      %47 = vector.extract_strided_slice %16 {offsets = [1, 0], sizes = [8, 64], strides = [1, 1]} : vector<9x64xbf16> to vector<8x64xbf16>
      %48 = vector.extract_strided_slice %21 {offsets = [0, 0], sizes = [8, 64], strides = [1, 1]} : vector<9x64xbf16> to vector<8x64xbf16>
      %49 = vector.extract_strided_slice %21 {offsets = [1, 0], sizes = [8, 64], strides = [1, 1]} : vector<9x64xbf16> to vector<8x64xbf16>
      %50 = vector.extract_strided_slice %26 {offsets = [0, 0], sizes = [8, 64], strides = [1, 1]} : vector<9x64xbf16> to vector<8x64xbf16>
      %51 = vector.extract_strided_slice %26 {offsets = [1, 0], sizes = [8, 64], strides = [1, 1]} : vector<9x64xbf16> to vector<8x64xbf16>
      %52 = vector.extract_strided_slice %31 {offsets = [0, 0], sizes = [8, 64], strides = [1, 1]} : vector<9x64xbf16> to vector<8x64xbf16>
      %53 = vector.extract_strided_slice %31 {offsets = [1, 0], sizes = [8, 64], strides = [1, 1]} : vector<9x64xbf16> to vector<8x64xbf16>
      %54 = vector.extract_strided_slice %36 {offsets = [0, 0], sizes = [8, 64], strides = [1, 1]} : vector<9x64xbf16> to vector<8x64xbf16>
      %55 = vector.extract_strided_slice %36 {offsets = [1, 0], sizes = [8, 64], strides = [1, 1]} : vector<9x64xbf16> to vector<8x64xbf16>
      %56 = vector.extract_strided_slice %41 {offsets = [0, 0], sizes = [8, 64], strides = [1, 1]} : vector<9x64xbf16> to vector<8x64xbf16>
      %57 = vector.extract_strided_slice %41 {offsets = [1, 0], sizes = [8, 64], strides = [1, 1]} : vector<9x64xbf16> to vector<8x64xbf16>
      %c0_40 = arith.constant 0 : index
      %c0_41 = arith.constant 0 : index
      %58 = vector.load %arg8[%c0_40, %c0_41] : memref<32x576xbf16, #tpu.memory_space<vmem>>, vector<8x64xbf16>
      tpu.vector_store %arg8[%c0_40, %c0_41], %42 {strides = array<i32>} : memref<32x576xbf16, #tpu.memory_space<vmem>>, vector<8x64xbf16>,
      %c0_42 = arith.constant 0 : index
      %c64 = arith.constant 64 : index
      %59 = vector.load %arg8[%c0_42, %c64] : memref<32x576xbf16, #tpu.memory_space<vmem>>, vector<8x64xbf16>
      tpu.vector_store %arg8[%c0_42, %c64], %44 {strides = array<i32>} : memref<32x576xbf16, #tpu.memory_space<vmem>>, vector<8x64xbf16>,
      %c0_43 = arith.constant 0 : index
      %c128 = arith.constant 128 : index
      %60 = vector.load %arg8[%c0_43, %c128] : memref<32x576xbf16, #tpu.memory_space<vmem>>, vector<8x64xbf16>
      tpu.vector_store %arg8[%c0_43, %c128], %43 {strides = array<i32>} : memref<32x576xbf16, #tpu.memory_space<vmem>>, vector<8x64xbf16>,
      %c0_44 = arith.constant 0 : index
      %c192 = arith.constant 192 : index
      %61 = vector.load %arg8[%c0_44, %c192] : memref<32x576xbf16, #tpu.memory_space<vmem>>, vector<8x64xbf16>
      tpu.vector_store %arg8[%c0_44, %c192], %46 {strides = array<i32>} : memref<32x576xbf16, #tpu.memory_space<vmem>>, vector<8x64xbf16>,
      %c0_45 = arith.constant 0 : index
      %c256 = arith.constant 256 : index
      %62 = vector.load %arg8[%c0_45, %c256] : memref<32x576xbf16, #tpu.memory_space<vmem>>, vector<8x64xbf16>
      tpu.vector_store %arg8[%c0_45, %c256], %48 {strides = array<i32>} : memref<32x576xbf16, #tpu.memory_space<vmem>>, vector<8x64xbf16>,
      %c0_46 = arith.constant 0 : index
      %c320 = arith.constant 320 : index
      %63 = vector.load %arg8[%c0_46, %c320] : memref<32x576xbf16, #tpu.memory_space<vmem>>, vector<8x64xbf16>
      tpu.vector_store %arg8[%c0_46, %c320], %47 {strides = array<i32>} : memref<32x576xbf16, #tpu.memory_space<vmem>>, vector<8x64xbf16>,
      %c0_47 = arith.constant 0 : index
      %c384 = arith.constant 384 : index
      %64 = vector.load %arg8[%c0_47, %c384] : memref<32x576xbf16, #tpu.memory_space<vmem>>, vector<8x64xbf16>
      tpu.vector_store %arg8[%c0_47, %c384], %50 {strides = array<i32>} : memref<32x576xbf16, #tpu.memory_space<vmem>>, vector<8x64xbf16>,
      %c0_48 = arith.constant 0 : index
      %c448 = arith.constant 448 : index
      %65 = vector.load %arg8[%c0_48, %c448] : memref<32x576xbf16, #tpu.memory_space<vmem>>, vector<8x64xbf16>
      tpu.vector_store %arg8[%c0_48, %c448], %52 {strides = array<i32>} : memref<32x576xbf16, #tpu.memory_space<vmem>>, vector<8x64xbf16>,
      %c0_49 = arith.constant 0 : index
      %c512 = arith.constant 512 : index
      %66 = vector.load %arg8[%c0_49, %c512] : memref<32x576xbf16, #tpu.memory_space<vmem>>, vector<8x64xbf16>
      tpu.vector_store %arg8[%c0_49, %c512], %51 {strides = array<i32>} : memref<32x576xbf16, #tpu.memory_space<vmem>>, vector<8x64xbf16>,
      %c8 = arith.constant 8 : index
      %c0_50 = arith.constant 0 : index
      %67 = vector.load %arg8[%c8, %c0_50] : memref<32x576xbf16, #tpu.memory_space<vmem>>, vector<8x64xbf16>
      tpu.vector_store %arg8[%c8, %c0_50], %44 {strides = array<i32>} : memref<32x576xbf16, #tpu.memory_space<vmem>>, vector<8x64xbf16>,
      %c8_51 = arith.constant 8 : index
      %c64_52 = arith.constant 64 : index
      %68 = vector.load %arg8[%c8_51, %c64_52] : memref<32x576xbf16, #tpu.memory_space<vmem>>, vector<8x64xbf16>
      tpu.vector_store %arg8[%c8_51, %c64_52], %43 {strides = array<i32>} : memref<32x576xbf16, #tpu.memory_space<vmem>>, vector<8x64xbf16>,
      %c8_53 = arith.constant 8 : index
      %c128_54 = arith.constant 128 : index
      %69 = vector.load %arg8[%c8_53, %c128_54] : memref<32x576xbf16, #tpu.memory_space<vmem>>, vector<8x64xbf16>
      tpu.vector_store %arg8[%c8_53, %c128_54], %45 {strides = array<i32>} : memref<32x576xbf16, #tpu.memory_space<vmem>>, vector<8x64xbf16>,
      %c8_55 = arith.constant 8 : index
      %c192_56 = arith.constant 192 : index
      %70 = vector.load %arg8[%c8_55, %c192_56] : memref<32x576xbf16, #tpu.memory_space<vmem>>, vector<8x64xbf16>
      tpu.vector_store %arg8[%c8_55, %c192_56], %48 {strides = array<i32>} : memref<32x576xbf16, #tpu.memory_space<vmem>>, vector<8x64xbf16>,
      %c8_57 = arith.constant 8 : index
      %c256_58 = arith.constant 256 : index
      %71 = vector.load %arg8[%c8_57, %c256_58] : memref<32x576xbf16, #tpu.memory_space<vmem>>, vector<8x64xbf16>
      tpu.vector_store %arg8[%c8_57, %c256_58], %47 {strides = array<i32>} : memref<32x576xbf16, #tpu.memory_space<vmem>>, vector<8x64xbf16>,
      %c8_59 = arith.constant 8 : index
      %c320_60 = arith.constant 320 : index
      %72 = vector.load %arg8[%c8_59, %c320_60] : memref<32x576xbf16, #tpu.memory_space<vmem>>, vector<8x64xbf16>
      tpu.vector_store %arg8[%c8_59, %c320_60], %49 {strides = array<i32>} : memref<32x576xbf16, #tpu.memory_space<vmem>>, vector<8x64xbf16>,
      %c8_61 = arith.constant 8 : index
      %c384_62 = arith.constant 384 : index
      %73 = vector.load %arg8[%c8_61, %c384_62] : memref<32x576xbf16, #tpu.memory_space<vmem>>, vector<8x64xbf16>
      tpu.vector_store %arg8[%c8_61, %c384_62], %52 {strides = array<i32>} : memref<32x576xbf16, #tpu.memory_space<vmem>>, vector<8x64xbf16>,
      %c8_63 = arith.constant 8 : index
      %c448_64 = arith.constant 448 : index
      %74 = vector.load %arg8[%c8_63, %c448_64] : memref<32x576xbf16, #tpu.memory_space<vmem>>, vector<8x64xbf16>
      tpu.vector_store %arg8[%c8_63, %c448_64], %51 {strides = array<i32>} : memref<32x576xbf16, #tpu.memory_space<vmem>>, vector<8x64xbf16>,
      %c8_65 = arith.constant 8 : index
      %c512_66 = arith.constant 512 : index
      %75 = vector.load %arg8[%c8_65, %c512_66] : memref<32x576xbf16, #tpu.memory_space<vmem>>, vector<8x64xbf16>
      tpu.vector_store %arg8[%c8_65, %c512_66], %53 {strides = array<i32>} : memref<32x576xbf16, #tpu.memory_space<vmem>>, vector<8x64xbf16>,
      %c16 = arith.constant 16 : index
      %c0_67 = arith.constant 0 : index
      %76 = vector.load %arg8[%c16, %c0_67] : memref<32x576xbf16, #tpu.memory_space<vmem>>, vector<8x64xbf16>
      tpu.vector_store %arg8[%c16, %c0_67], %46 {strides = array<i32>} : memref<32x576xbf16, #tpu.memory_space<vmem>>, vector<8x64xbf16>,
      %c16_68 = arith.constant 16 : index
      %c64_69 = arith.constant 64 : index
      %77 = vector.load %arg8[%c16_68, %c64_69] : memref<32x576xbf16, #tpu.memory_space<vmem>>, vector<8x64xbf16>
      tpu.vector_store %arg8[%c16_68, %c64_69], %48 {strides = array<i32>} : memref<32x576xbf16, #tpu.memory_space<vmem>>, vector<8x64xbf16>,
      %c16_70 = arith.constant 16 : index
      %c128_71 = arith.constant 128 : index
      %78 = vector.load %arg8[%c16_70, %c128_71] : memref<32x576xbf16, #tpu.memory_space<vmem>>, vector<8x64xbf16>
      tpu.vector_store %arg8[%c16_70, %c128_71], %47 {strides = array<i32>} : memref<32x576xbf16, #tpu.memory_space<vmem>>, vector<8x64xbf16>,
      %c16_72 = arith.constant 16 : index
      %c192_73 = arith.constant 192 : index
      %79 = vector.load %arg8[%c16_72, %c192_73] : memref<32x576xbf16, #tpu.memory_space<vmem>>, vector<8x64xbf16>
      tpu.vector_store %arg8[%c16_72, %c192_73], %50 {strides = array<i32>} : memref<32x576xbf16, #tpu.memory_space<vmem>>, vector<8x64xbf16>,
      %c16_74 = arith.constant 16 : index
      %c256_75 = arith.constant 256 : index
      %80 = vector.load %arg8[%c16_74, %c256_75] : memref<32x576xbf16, #tpu.memory_space<vmem>>, vector<8x64xbf16>
      tpu.vector_store %arg8[%c16_74, %c256_75], %52 {strides = array<i32>} : memref<32x576xbf16, #tpu.memory_space<vmem>>, vector<8x64xbf16>,
      %c16_76 = arith.constant 16 : index
      %c320_77 = arith.constant 320 : index
      %81 = vector.load %arg8[%c16_76, %c320_77] : memref<32x576xbf16, #tpu.memory_space<vmem>>, vector<8x64xbf16>
      tpu.vector_store %arg8[%c16_76, %c320_77], %51 {strides = array<i32>} : memref<32x576xbf16, #tpu.memory_space<vmem>>, vector<8x64xbf16>,
      %c16_78 = arith.constant 16 : index
      %c384_79 = arith.constant 384 : index
      %82 = vector.load %arg8[%c16_78, %c384_79] : memref<32x576xbf16, #tpu.memory_space<vmem>>, vector<8x64xbf16>
      tpu.vector_store %arg8[%c16_78, %c384_79], %54 {strides = array<i32>} : memref<32x576xbf16, #tpu.memory_space<vmem>>, vector<8x64xbf16>,
      %c16_80 = arith.constant 16 : index
      %c448_81 = arith.constant 448 : index
      %83 = vector.load %arg8[%c16_80, %c448_81] : memref<32x576xbf16, #tpu.memory_space<vmem>>, vector<8x64xbf16>
      tpu.vector_store %arg8[%c16_80, %c448_81], %56 {strides = array<i32>} : memref<32x576xbf16, #tpu.memory_space<vmem>>, vector<8x64xbf16>,
      %c16_82 = arith.constant 16 : index
      %c512_83 = arith.constant 512 : index
      %84 = vector.load %arg8[%c16_82, %c512_83] : memref<32x576xbf16, #tpu.memory_space<vmem>>, vector<8x64xbf16>
      tpu.vector_store %arg8[%c16_82, %c512_83], %55 {strides = array<i32>} : memref<32x576xbf16, #tpu.memory_space<vmem>>, vector<8x64xbf16>,
      %c24 = arith.constant 24 : index
      %c0_84 = arith.constant 0 : index
      %85 = vector.load %arg8[%c24, %c0_84] : memref<32x576xbf16, #tpu.memory_space<vmem>>, vector<8x64xbf16>
      tpu.vector_store %arg8[%c24, %c0_84], %48 {strides = array<i32>} : memref<32x576xbf16, #tpu.memory_space<vmem>>, vector<8x64xbf16>,
      %c24_85 = arith.constant 24 : index
      %c64_86 = arith.constant 64 : index
      %86 = vector.load %arg8[%c24_85, %c64_86] : memref<32x576xbf16, #tpu.memory_space<vmem>>, vector<8x64xbf16>
      tpu.vector_store %arg8[%c24_85, %c64_86], %47 {strides = array<i32>} : memref<32x576xbf16, #tpu.memory_space<vmem>>, vector<8x64xbf16>,
      %c24_87 = arith.constant 24 : index
      %c128_88 = arith.constant 128 : index
      %87 = vector.load %arg8[%c24_87, %c128_88] : memref<32x576xbf16, #tpu.memory_space<vmem>>, vector<8x64xbf16>
      tpu.vector_store %arg8[%c24_87, %c128_88], %49 {strides = array<i32>} : memref<32x576xbf16, #tpu.memory_space<vmem>>, vector<8x64xbf16>,
      %c24_89 = arith.constant 24 : index
      %c192_90 = arith.constant 192 : index
      %88 = vector.load %arg8[%c24_89, %c192_90] : memref<32x576xbf16, #tpu.memory_space<vmem>>, vector<8x64xbf16>
      tpu.vector_store %arg8[%c24_89, %c192_90], %52 {strides = array<i32>} : memref<32x576xbf16, #tpu.memory_space<vmem>>, vector<8x64xbf16>,
      %c24_91 = arith.constant 24 : index
      %c256_92 = arith.constant 256 : index
      %89 = vector.load %arg8[%c24_91, %c256_92] : memref<32x576xbf16, #tpu.memory_space<vmem>>, vector<8x64xbf16>
      tpu.vector_store %arg8[%c24_91, %c256_92], %51 {strides = array<i32>} : memref<32x576xbf16, #tpu.memory_space<vmem>>, vector<8x64xbf16>,
      %c24_93 = arith.constant 24 : index
      %c320_94 = arith.constant 320 : index
      %90 = vector.load %arg8[%c24_93, %c320_94] : memref<32x576xbf16, #tpu.memory_space<vmem>>, vector<8x64xbf16>
      tpu.vector_store %arg8[%c24_93, %c320_94], %53 {strides = array<i32>} : memref<32x576xbf16, #tpu.memory_space<vmem>>, vector<8x64xbf16>,
      %c24_95 = arith.constant 24 : index
      %c384_96 = arith.constant 384 : index
      %91 = vector.load %arg8[%c24_95, %c384_96] : memref<32x576xbf16, #tpu.memory_space<vmem>>, vector<8x64xbf16>
      tpu.vector_store %arg8[%c24_95, %c384_96], %56 {strides = array<i32>} : memref<32x576xbf16, #tpu.memory_space<vmem>>, vector<8x64xbf16>,
      %c24_97 = arith.constant 24 : index
      %c448_98 = arith.constant 448 : index
      %92 = vector.load %arg8[%c24_97, %c448_98] : memref<32x576xbf16, #tpu.memory_space<vmem>>, vector<8x64xbf16>
      tpu.vector_store %arg8[%c24_97, %c448_98], %55 {strides = array<i32>} : memref<32x576xbf16, #tpu.memory_space<vmem>>, vector<8x64xbf16>,
      %c24_99 = arith.constant 24 : index
      %c512_100 = arith.constant 512 : index
      %93 = vector.load %arg8[%c24_99, %c512_100] : memref<32x576xbf16, #tpu.memory_space<vmem>>, vector<8x64xbf16>
      tpu.vector_store %arg8[%c24_99, %c512_100], %57 {strides = array<i32>} : memref<32x576xbf16, #tpu.memory_space<vmem>>, vector<8x64xbf16>,
      %c0_101 = arith.constant 0 : index
      %c0_102 = arith.constant 0 : index
      %94 = vector.load %arg8[%c0_101, %c0_102] : memref<32x576xbf16, #tpu.memory_space<vmem>>, vector<32x576xbf16>
      %c0_103 = arith.constant 0 : index
      %c0_104 = arith.constant 0 : index
      %95 = vector.load %arg4[%c0_103, %c0_104] : memref<576x32xbf16, #tpu.memory_space<vmem>>, vector<576x32xbf16>
      %cst = arith.constant dense<0.000000e+00> : vector<32x32xf32>
      %96 = tpu.matmul %94, %95, %cst {dimension_numbers = #tpu.dot_dimension_numbers<[1], [0], [0], [1], [0, 0, 1, 1], [], []>} : vector<32x576xbf16>, vector<576x32xbf16>, vector<32x32xf32> -> vector<32x32xf32>
      %97 = vector.extract_strided_slice %96 {offsets = [0, 0], sizes = [8, 32], strides = [1, 1]} : vector<32x32xf32> to vector<8x32xf32>
      %98 = vector.extract_strided_slice %96 {offsets = [8, 0], sizes = [8, 32], strides = [1, 1]} : vector<32x32xf32> to vector<8x32xf32>
      %99 = arith.maximumf %97, %98 : vector<8x32xf32>
      %100 = vector.extract_strided_slice %96 {offsets = [16, 0], sizes = [8, 32], strides = [1, 1]} : vector<32x32xf32> to vector<8x32xf32>
      %101 = vector.extract_strided_slice %96 {offsets = [24, 0], sizes = [8, 32], strides = [1, 1]} : vector<32x32xf32> to vector<8x32xf32>
      %102 = arith.maximumf %100, %101 : vector<8x32xf32>
      %103 = arith.maximumf %99, %102 : vector<8x32xf32>
      %c0_105 = arith.constant 0 : index
      %c0_106 = arith.constant 0 : index
      %104 = vector.load %arg5[%c0_105, %c0_106] : memref<1x32xf32, #tpu.memory_space<vmem>>, vector<1x32xf32>
      %105 = vector.broadcast %104 : vector<1x32xf32> to vector<8x32xf32>
      %106 = arith.addf %103, %105 : vector<8x32xf32>
      %cst_107 = arith.constant 0.000000e+00 : f32
      %107 = vector.broadcast %cst_107 : f32 to vector<8x32xf32>
      %108 = arith.maximumf %106, %107 : vector<8x32xf32>
      %c0_108 = arith.constant 0 : index
      %109 = arith.index_cast %arg9 : i32 to index
      %c0_109 = arith.constant 0 : index
      %c0_110 = arith.constant 0 : index
      %110 = vector.load %arg6[%c0_108, %109, %c0_109, %c0_110] : memref<1x8x8x32xf32, #tpu.memory_space<vmem>>, vector<1x1x8x32xf32>
      %111 = vector.shape_cast %110 : vector<1x1x8x32xf32> to vector<8x32xf32>
      %112 = vector.shape_cast %108 : vector<8x32xf32> to vector<1x1x8x32xf32>
      tpu.vector_store %arg6[%c0_108, %109, %c0_109, %c0_110], %112 {strides = array<i32>} : memref<1x8x8x32xf32, #tpu.memory_space<vmem>>, vector<1x1x8x32xf32>,
    }
    %c8_i32_3 = arith.constant 8 : i32
    return
  }
  func.func @transform_0(%arg0: i32) -> (i32, i32, i32, i32, i32) {
    %c0_i32 = arith.constant 0 : i32
    %c0_i32_0 = arith.constant 0 : i32
    %c0_i32_1 = arith.constant 0 : i32
    %c0_i32_2 = arith.constant 0 : i32
    %c0_i32_3 = arith.constant 0 : i32
    return %arg0, %c0_i32, %c0_i32_0, %c0_i32_1, %c0_i32_2 : i32, i32, i32, i32, i32
  }
  func.func @transform_1(%arg0: i32) -> (i32, i32) {
    %c0_i32 = arith.constant 0 : i32
    %c0_i32_0 = arith.constant 0 : i32
    %c0_i32_1 = arith.constant 0 : i32
    return %c0_i32, %c0_i32_0 : i32, i32
  }
  func.func @transform_2(%arg0: i32) -> (i32, i32) {
    %c0_i32 = arith.constant 0 : i32
    %c0_i32_0 = arith.constant 0 : i32
    %c0_i32_1 = arith.constant 0 : i32
    return %c0_i32, %c0_i32_0 : i32, i32
  }
  func.func @transform_3(%arg0: i32) -> (i32, i32) {
    %c0_i32 = arith.constant 0 : i32
    %c0_i32_0 = arith.constant 0 : i32
    %c0_i32_1 = arith.constant 0 : i32
    return %c0_i32, %c0_i32_0 : i32, i32
  }
  func.func @transform_4(%arg0: i32) -> (i32, i32) {
    %c0_i32 = arith.constant 0 : i32
    %c0_i32_0 = arith.constant 0 : i32
    %c0_i32_1 = arith.constant 0 : i32
    return %c0_i32, %c0_i32_0 : i32, i32
  }
  func.func @transform_5(%arg0: i32) -> (i32, i32, i32, i32) {
    %c0_i32 = arith.constant 0 : i32
    %c0_i32_0 = arith.constant 0 : i32
    %c0_i32_1 = arith.constant 0 : i32
    %c0_i32_2 = arith.constant 0 : i32
    return %arg0, %c0_i32, %c0_i32_0, %c0_i32_1 : i32, i32, i32, i32
  }
}

module attributes {stable_mosaic.version = 11 : i64} {
  func.func @_fc_kernel(%arg0: i32, %arg1: memref<2x256xbf16, #tpu.memory_space<vmem>>, %arg2: memref<256x2xbf16, #tpu.memory_space<vmem>>, %arg3: memref<1x2xf32, #tpu.memory_space<vmem>>, %arg4: memref<2x2xf32, #tpu.memory_space<vmem>>) attributes {dimension_semantics = [#tpu.dimension_semantics<arbitrary>], iteration_bounds = array<i64: 8>, scalar_prefetch = 0 : i64, scratch_operands = 0 : i64, tpu.core_type = #tpu.core_type<tc>, window_params = [{transform_indices = @transform_0, window_bounds = array<i64: 2, 256>}, {transform_indices = @transform_1, window_bounds = array<i64: 256, 2>}, {pipeline_mode = #tpu.pipeline_mode<synchronous>, transform_indices = @transform_2, window_bounds = array<i64: 1, 2>}, {pipeline_mode = #tpu.pipeline_mode<synchronous>, transform_indices = @transform_3, window_bounds = array<i64: 2, 2>}]} {
    %c0_i32 = arith.constant 0 : i32
    %0 = arith.cmpi eq, %arg0, %c0_i32 : i32
    %1 = arith.extui %0 : i1 to i32
    %c0_i32_0 = arith.constant 0 : i32
    %2 = arith.cmpi ne, %1, %c0_i32_0 : i32
    scf.if %2 {
      %c0_8 = arith.constant 0 : index
      %c0_9 = arith.constant 0 : index
      %9 = vector.load %arg3[%c0_8, %c0_9] : memref<1x2xf32, #tpu.memory_space<vmem>>, vector<1x2xf32>
      %10 = vector.shape_cast %9 : vector<1x2xf32> to vector<1x2xf32>
      %11 = vector.broadcast %10 : vector<1x2xf32> to vector<2x2xf32>
      %c0_10 = arith.constant 0 : index
      %c0_11 = arith.constant 0 : index
      %12 = vector.load %arg4[%c0_10, %c0_11] : memref<2x2xf32, #tpu.memory_space<vmem>>, vector<2x2xf32>
      tpu.vector_store %arg4[%c0_10, %c0_11], %11 {strides = array<i32>} : memref<2x2xf32, #tpu.memory_space<vmem>>, vector<2x2xf32>,
    } else {
    }
    %c0 = arith.constant 0 : index
    %c0_1 = arith.constant 0 : index
    %3 = vector.load %arg4[%c0, %c0_1] : memref<2x2xf32, #tpu.memory_space<vmem>>, vector<2x2xf32>
    %c0_2 = arith.constant 0 : index
    %c0_3 = arith.constant 0 : index
    %4 = vector.load %arg1[%c0_2, %c0_3] : memref<2x256xbf16, #tpu.memory_space<vmem>>, vector<2x256xbf16>
    %c0_4 = arith.constant 0 : index
    %c0_5 = arith.constant 0 : index
    %5 = vector.load %arg2[%c0_4, %c0_5] : memref<256x2xbf16, #tpu.memory_space<vmem>>, vector<256x2xbf16>
    %cst = arith.constant dense<0.000000e+00> : vector<2x2xf32>
    %6 = tpu.matmul %4, %5, %cst {dimension_numbers = #tpu.dot_dimension_numbers<[1], [0], [0], [1], [0, 0, 1, 1], [], []>} : vector<2x256xbf16>, vector<256x2xbf16>, vector<2x2xf32> -> vector<2x2xf32>
    %7 = arith.addf %3, %6 : vector<2x2xf32>
    %c0_6 = arith.constant 0 : index
    %c0_7 = arith.constant 0 : index
    %8 = vector.load %arg4[%c0_6, %c0_7] : memref<2x2xf32, #tpu.memory_space<vmem>>, vector<2x2xf32>
    tpu.vector_store %arg4[%c0_6, %c0_7], %7 {strides = array<i32>} : memref<2x2xf32, #tpu.memory_space<vmem>>, vector<2x2xf32>,
    return
  }
  func.func @transform_0(%arg0: i32) -> (i32, i32) {
    %c0_i32 = arith.constant 0 : i32
    %c0_i32_0 = arith.constant 0 : i32
    return %c0_i32, %arg0 : i32, i32
  }
  func.func @transform_1(%arg0: i32) -> (i32, i32) {
    %c0_i32 = arith.constant 0 : i32
    %c0_i32_0 = arith.constant 0 : i32
    return %arg0, %c0_i32 : i32, i32
  }
  func.func @transform_2(%arg0: i32) -> (i32, i32) {
    %c0_i32 = arith.constant 0 : i32
    %c0_i32_0 = arith.constant 0 : i32
    %c0_i32_1 = arith.constant 0 : i32
    return %c0_i32, %c0_i32_0 : i32, i32
  }
  func.func @transform_3(%arg0: i32) -> (i32, i32) {
    %c0_i32 = arith.constant 0 : i32
    %c0_i32_0 = arith.constant 0 : i32
    %c0_i32_1 = arith.constant 0 : i32
    return %c0_i32, %c0_i32_0 : i32, i32
  }
}

</mosaic_0001>

<bundles_post_ra>
// kernel: simple_cnn_forward.2
= control target key start
LH: loop header
LB: loop body
LE: loop exit
PB: predicated region body
PF: predicated region fallthrough
CT: control target
= control target key end

     0   :  { %s1661_s18 = smov 0   ;;  %s1939_s0 = inlined_call_operand.vmem [shape: bf16[2,18,2,9,9], index: 0, kind: input, shape index: {}]   ;;  %s1940_s1 = inlined_call_operand.vmem [shape: bf16[9,64], index: 1, kind: input, shape index: {}]   ;;  %s1941_s2 = inlined_call_operand.vmem [shape: f32[1,64], index: 2, kind: input, shape index: {}]   ;;  %s1942_s3 = inlined_call_operand.vmem [shape: bf16[576,32], index: 3, kind: input, shape index: {}]   ;;  %s1943_s4 = inlined_call_operand.vmem [shape: f32[1,32], index: 4, kind: input, shape index: {}]   ;;  %s1944_s5 = inlined_call_operand.vmem [shape: f32[2,8,8,32], index: 5, kind: output, shape index: {}]  }
   0x1 LB: > { %s1289_s19 = sadd.s32 4294967295, %s1617_s18   ;;  %p1293_p0 = scmp.ge.s32.totalorder %s1617_s18, 1  ;;  %s1617_s18 = sphi %s1661_s18, %s15_s18  }
   0x2   : > { %p187_p1 = scmp.lt.s32.totalorder %s1617_s18, 3 }
   0x4   : > { %p188_p2 = pnand %p1293_p0, %p187_p1 }
   0x5   : > { %p215_p3 = scmp.lt.s32.totalorder (!%p188_p2), %s1289_s19, 1  ;;  %s1679_s28 = smov (!%p188_p2), 0  }
   0x6   : > { %191 = sbr.rel (%p188_p2) target bundleno = 640 (0x280), region = 40 }
   0xd   : > { %s1948_s19 = smov (!%p215_p3, %s1289_s19), 1 }
   0xe   : > { %s1523_s20 = smul.u32 288, %s1948_s19  ;;  %s1412_s21 = sshll.u32 %s1948_s19, 6 }
   0xf   : > { %s1672_s24 = scalar_lea.vmem %s1944_s5, %s1412_s21 }
  0x10   : > { %s1677_s27 = scalar_lea.vmem %s1939_s0, %s1523_s20 }
  0x11 LB: >> { %vm267_vm0 = vcmask 1043456   ;;  %v1627_v0 = vmov 0.0   ;;  %v1552_v1 = vld [vmem:[%s1940_s1] sm:$0x1f]   ;;  %vm268_vm1 = vcmask 1044480   ;;  %v1628_v2 = vmov 65535   ;;  %s1621_s28 = sphi %s1679_s28, %s231_s28  }
  0x12   : >> { %1499 = vmatprep.subr.bf16.mxu0 %v1627_v0  ;;  %1505 = vmatprep.subr.bf16.mxu1 %v1627_v0  ;;  %v269_v3 = vsel %vm267_vm0, 4294967295, %v1628_v2  ;;  %v1553_v4 = vld [vmem:[%s1940_s1] sm:$0x1f]   ;;  %vm1629_vm2 = vmmov 0   ;;  %s1413_s8 = sshll.u32 %s1621_s28, 4  ;;  %vm263_vm3 = vcmask 72704   ;;  %v236_v13 = vlaneseq }
  0x13   : >> { %v270_v5 = vsel %vm268_vm1, %v269_v3, 0  ;;  %1501 = vmatprep.mubr.msk.bf16.mxu0 %vm1629_vm2, %v1627_v0  ;;  %1507 = vmatprep.mubr.msk.bf16.mxu1 %vm1629_vm2, %v1627_v0  ;;  %s241_s9 = scalar_lea.vmem %s1677_s27, %s1413_s8  ;;  %vm342_vm4 = vcmask 516096   ;;  %vm343_vm5 = vsmask.f32 256  ;;  %s1696_s10 = scalar_lea.vmem [#allocation2], %s1413_s8  ;;  %vm340_vm10 = vcmask 519168  }
  0x14   : >> { %v272_v6 = vand.u32 %v1552_v1, %v270_v5  ;;  %v376_v7 = vand.u32 %v1553_v4, %v270_v5  ;;  %v1554_v8 = vld [vmem:[%s241_s9] sm:$0x1f]   ;;  %v1555_v9 = vld [vmem:[%s241_s9 + $0x8] sm:$0x1f]   ;;  %vm1692_vm6 = vmand %vm342_vm4, %vm343_vm5  ;;  %p232_p4 = scmp.ge.s32.totalorder %s1621_s28, 1  ;;  %p233_p5 = scmp.le.s32.totalorder %s1621_s28, 16 }
  0x15   : >> { %v1320_v11 = vld [vmem:[%s1696_s10 + $0xc] sm:$0x1]  ;;  %v237_v14 = vshrl.u32 %v236_v13, 7  ;;  %v1299_v16 = vld [vmem:[%s1941_s2] ss:$0 sm:$0xff]  ;;  %s231_s28 = sadd.s32 1, %s1621_s28  }
  0x16   : >> { %1500 = vmatpush3.bf16.msra.mxu0 %v272_v6  ;;  %1506 = vmatpush3.bf16.msra.mxu1 %v376_v7  ;;  %v443_v12 = vsel %vm1692_vm6, 0.0|0.0, %v1320_v11  ;;  %p234_p6 = pnand %p233_p5, %p232_p4  ;;  %v345_v36 = vld [vmem:[%s1696_s10 + $0x4] sm:$0x1]  ;;  %p228_p7 = scmp.ge.s32.totalorder %s231_s28, 18  }
  0x17   : >> { %1321 = vst [vmem:[%s1696_s10 + $0xc] sm:$0x1] %v443_v12  ;;  %vm317_vm7 = vcmp.ge.s32.totalorder %v237_v14, 1  ;;  %s1721_s14 = smov (%p228_p7), 0  }
  0x18   : >> { %s1303_s11 = scalar_select %p234_p6, 0, 1 }
  0x19   : >> { %1502 = vmatmul.mubr.msk.bf16.vlgmr.msra.gmra.mrb[0].mxu0 %vm263_vm3, %v1554_v8  ;;  %1508 = vmatmul.mubr.msk.bf16.vlgmr.msra.gmra.mrb[0].mxu1 %vm263_vm3, %v1555_v9 }
  0x1a   : >> { %v320_v15 = vstv %s1303_s11 }
  0x1b   : >> { %vm321_vm8 = vcmp.eq.s32.totalorder %v320_v15, 1 }
  0x1c   : >> { %vm322_vm9 = vmand %vm321_vm8, %vm317_vm7 }
  0xec   : >> { %v308_v17 = vpop.f32.mrb[0].mxu0  ;;  %v412_v18 = vpop.f32.mrb[0].mxu1 }
  0xed   : >> { %v309_v19 = vadd.f32 %v1299_v16, %v308_v17  ;;  %v413_v20 = vadd.f32 %v1299_v16, %v412_v18  ;;  %v1503_v21 = vpop.f32.mrb[1].mxu0  ;;  %v1509_v22 = vpop.f32.mrb[1].mxu1 }
  0xee   : >> { %v311_v23 = vpop.f32.mrb[2].mxu0  ;;  %v415_v24 = vpop.f32.mrb[2].mxu1 }
  0xef   : >> { %v315_v25 = vmax.f32 %v309_v19, 0.0  ;;  %v419_v26 = vmax.f32 %v413_v20, 0.0  ;;  %v312_v27 = vadd.f32 %v1299_v16, %v311_v23  ;;  %v1504_v28 = vpop.f32.mrb[3].mxu0  ;;  %v1510_v29 = vpop.f32.mrb[3].mxu1 }
  0xf1   : >> { %v328_v30 = vsel %vm322_vm9, %v315_v25, 0.0  ;;  %v429_v31 = vsel %vm321_vm8, %v419_v26, 0.0  ;;  %v316_v32 = vmax.f32 %v312_v27, 0.0  ;;  %230 = sbr.rel (!%p228_p7) target bundleno = 17 (0x11), region = 97 }
  0xf2   : >> { %v1414_v33 = vpack.c.bf16 %v328_v30, %v328_v30  ;;  %v1418_v34 = vpack.c.bf16 %v429_v31, %v429_v31 }
  0xf3   : >> { %v329_v35 = vsel %vm321_vm8, %v316_v32, 0.0 }
  0xf4   : >> { %341 = vst.msk [vmem:[%s1696_s10] sm:$0xf] %vm340_vm10, %v1414_v33  ;;  %1319 = vst.msk [vmem:[%s1696_s10 + $0x8] sm:$0xf] %vm340_vm10, %v1418_v34  ;;  %v1415_v37 = vpack.c.bf16 %v329_v35, %v329_v35 }
  0xf6   : >> { %v346_v38 = vsel %vm1692_vm6, %v1415_v37, %v345_v36 }
  0xf7   : >> { %347 = vst [vmem:[%s1696_s10 + $0x4] sm:$0x1] %v346_v38 }
  0xf8 LB: >> { %vm564_vm11 = vcmask 523268   ;;  %v1567_v39 = vld [vmem:[%s1942_s3 + $0x40] sm:$0xff]   ;;  %s1422_s17 = sshll.u32 %s1625_s14, 5  ;;  %v1569_v41 = vld [vmem:[%s1942_s3 + $0x48] sm:$0xff]   ;;  %s1630_s25 = smov 64   ;;  %v1571_v18 = vld [vmem:[%s1942_s3 + $0x50] sm:$0xff]   ;;  %s1625_s14 = sphi %s1721_s14, %s450_s14  }
  0xf9   : >> { %v1568_v40 = vld [vmem:[%s1942_s3] sm:$0xff]   ;;  %1437 = vmatprep.subr.bf16.mxu0 %v1567_v39  ;;  %s1736_s23 = scalar_lea.vmem [#allocation2], %s1422_s17  ;;  %v1570_v7 = vld [vmem:[%s1942_s3 + $0x8] sm:$0xff]   ;;  %v1573_v35 = vld [vmem:[%s1942_s3 + $0x10] sm:$0xff]   ;;  %vm503_vm12 = vcmask 1043968   ;;  %vm572_vm13 = vcmask 1048068  }
  0xfa   : >> { %1438 = vmatpush3.bf16.msra.mxu0 %v1568_v40  ;;  %v1572_v31 = vld [vmem:[%s1942_s3 + $0xc0] sm:$0xff]   ;;  %vm1007_vm14 = vcmask 523264   ;;  %s1409_s30 = sshll.u32 %s1625_s14, 3  ;;  %vm1175_vm15 = vcmask 261120   ;;  %s450_s14 = sadd.s32 1, %s1625_s14  }
  0xfb   : >> { %1439 = vmatprep.subr.bf16.mxu0 %v1569_v41  ;;  %1465 = vmatprep.subr.bf16.mxu1 %v1572_v31  ;;  %v1574_v41 = vld [vmem:[%s1942_s3 + $0x80] sm:$0xff]   ;;  %s1174_s6 = scalar_lea.vmem %s1672_s24, %s1409_s30  ;;  %p447_p8 = scmp.ge.s32.totalorder %s450_s14, 8  }
  0xfc   : >> { %1466 = vmatpush3.bf16.msra.mxu1 %v1574_v41 }
  0xfe   : >> { %v1331_v42 = vld [vmem:[%s1736_s23 + $0x10] sm:$0xf]  ;;  %v1332_v43 = vld [vmem:[%s1736_s23 + $0x14] sm:$0x1]  ;;  %v1327_v44 = vld [vmem:[%s1736_s23 + $0x8] sm:$0xf]  ;;  %1440 = vmatpush3.bf16.msra.mxu0 %v1570_v7 }
  0xff   : >> { %v1358_v45 = vcombine.low %v1331_v42, %v1331_v42  ;;  %v1359_v46 = vcombine.low %v1331_v42, %v1332_v43  ;;  %636 = vst.msk [vmem:[#allocation3 + $0x28] sm:$0xf] %vm340_vm10, %v1331_v42  ;;  %v1328_v47 = vld [vmem:[%s1736_s23 + $0xc] sm:$0x1]  ;;  %v1356_v48 = vcombine.low %v1327_v44, %v1327_v44  ;;  %v1336_v49 = vld [vmem:[%s1736_s23 + $0x18] sm:$0xf]  ;;  %1441 = vmatprep.subr.bf16.mxu0 %v1571_v18 }
 0x100   : >> { %v455_v50 = vld [vmem:[%s1736_s23] sm:$0xf]  ;;  %v1745_v51 = vcombine.low %v1327_v44, %v1328_v47  ;;  %v1363_v52 = vcombine.low %v1336_v49, %v1336_v49  ;;  %526 = vst.msk [vmem:[#allocation3 + $0x10] sm:$0xf] %vm340_vm10, %v1336_v49  ;;  %v456_v53 = vld [vmem:[%s1736_s23 + $0x4] sm:$0x1] }
 0x101   : >> { %496 = vst.msk [vmem:[#allocation3] sm:$0xf] %vm340_vm10, %v455_v50  ;;  %v1345_v54 = vld [vmem:[%s1736_s23 + $0x28] sm:$0xf]  ;;  %v1752_v55 = vld [vmem:[%s1736_s23 + $0x20] sm:$0xf]  ;;  %522 = vrot.lane.b32.xlu0 %v1358_v45, %s1630_s25  ;;  %500 = vrot.lane.b32.xlu1 %v1356_v48, %s1630_s25  ;;  %v1757_v56 = vcombine.low %v455_v50, %v456_v53 }
 0x102   : >> { %565 = vst.msk [vmem:[#allocation3] sm:$0xf0] %vm564_vm11, %v1356_v48  ;;  %v1360_v57 = vcombine.low %v1345_v54, %v1345_v54  ;;  %v1341_v58 = vld [vmem:[%s1736_s23 + $0x24] sm:$0x1]  ;;  %v531_v59 = vshrl.u32 %v1359_v46, 16  ;;  %v533_v60 = vshll.u32 %v1359_v46, 16  ;;  %1442 = vmatpush3.bf16.msra.mxu0 %v1573_v35  ;;  %v1366_v47 = vcombine.low %v1752_v55, %v1752_v55 }
 0x103   : >> { %645 = vst.msk [vmem:[#allocation3 + $0x38] sm:$0xf] %vm340_vm10, %v1345_v54  ;;  %541 = vst.msk [vmem:[#allocation3 + $0x18] sm:$0xf] %vm340_vm10, %v1752_v55  ;;  %v1337_v61 = vld [vmem:[%s1736_s23 + $0x1c] sm:$0x1]  ;;  %v1361_v63 = vcombine.low %v1752_v55, %v1341_v58 }
 0x104   : >> { %v578_v62 = vshrl.u32 %v1745_v51, 16  ;;  %673 = vst.msk [vmem:[#allocation3 + $0x28] sm:$0xf0] %vm564_vm11, %v1363_v52  ;;  %v1364_v0 = vcombine.low %v1336_v49, %v1337_v61  ;;  %v1354_v1 = vld [vmem:[%s1736_s23 + $0x38] sm:$0xf]  ;;  %v511_v2 = vshrl.u32 %v1757_v56, 16 }
 0x105   : >> { %v513_v3 = vshll.u32 %v1757_v56, 16  ;;  %615 = vst.msk [vmem:[#allocation3 + $0x18] sm:$0xf0] %vm564_vm11, %v1360_v57  ;;  %v535_v4 = vrot.slane %v533_v60, 1  ;;  %v1355_v5 = vld [vmem:[%s1736_s23 + $0x3c] sm:$0x1]  ;;  %590 = vrot.lane.b32.xlu0 %v1363_v52, %s1630_s25  ;;  %v1789_v26 = vcombine.low %v1354_v1, %v1354_v1 }
 0x106   : >> { %v1349_v6 = vld [vmem:[%s1736_s23 + $0x30] sm:$0xf]  ;;  %v1776_v8 = vrot.slane %v578_v62, 4  ;;  %v581_v9 = vshll.u32 %v1745_v51, 16  ;;  %v555_v10 = vshrl.u32 %v1361_v63, 16  ;;  %v557_v11 = vshll.u32 %v1361_v63, 16 }
 0x107   : >> { %v1350_v12 = vld [vmem:[%s1736_s23 + $0x34] sm:$0x1]  ;;  %650 = vst.msk [vmem:[#allocation3 + $0x40] sm:$0xf] %vm340_vm10, %v1349_v6  ;;  %v566_v13 = vrot.slane %v511_v2, 4  ;;  %v567_v14 = vrot.slane %v513_v3, 5  ;;  %v536_v15 = vor.u32 %v535_v4, %v531_v59  ;;  %v1369_v29 = vcombine.low %v1354_v1, %v1355_v5 }
 0x108   : >> { %v603_v16 = vshrl.u32 %v1364_v0, 16  ;;  %v1346_v17 = vld [vmem:[%s1736_s23 + $0x2c] sm:$0x1]  ;;  %v616_v19 = vrot.slane %v555_v10, 4  ;;  %v617_v20 = vrot.slane %v557_v11, 5  ;;  %v606_v21 = vshll.u32 %v1364_v0, 16 }
 0x109   : >> { %v594_v22 = vrot.slane %v531_v59, 4  ;;  %v568_v23 = vor.u32 %v567_v14, %v566_v13  ;;  %639 = vst.msk [vmem:[#allocation3 + $0x30] sm:$0xf] %vm340_vm10, %v536_v15  ;;  %v595_v25 = vrot.slane %v533_v60, 5  ;;  %v1368_v30 = vcombine.low %v1349_v6, %v1350_v12  ;;  %545 = vrot.lane.b32.xlu0 %v1360_v57, %s1630_s25  ;;  %v1575_v46 = vld [vmem:[%s1942_s3 + $0x58] sm:$0xff]   ;;  %v1576_v50 = vld [vmem:[%s1942_s3 + $0xc8] sm:$0xff]  }
 0x10a   : >> { %v605_v24 = vrot.slane %v603_v16, 4  ;;  %v618_v27 = vor.u32 %v617_v20, %v616_v19  ;;  %v608_v28 = vrot.slane %v606_v21, 5  ;;  %688 = vst.msk [vmem:[#allocation3 + $0x40] sm:$0xf0] %vm564_vm11, %v1789_v26  ;;  %v559_v33 = vrot.slane %v557_v11, 1  ;;  %1443 = vmatprep.subr.bf16.mxu0 %v1575_v46  ;;  %1467 = vmatprep.subr.bf16.mxu1 %v1576_v50  ;;  %v1577_v60 = vld [vmem:[%s1942_s3 + $0x18] sm:$0xff]  }
 0x10b   : >> { %569 = vrot.lane.b32.xlu1 %v568_v23, %s1630_s25  ;;  %v596_v32 = vor.u32 %v595_v25, %v594_v22  ;;  %v1365_v34 = vcombine.low %v1345_v54, %v1346_v17  ;;  %v515_v36 = vrot.slane %v513_v3, 1  ;;  %v583_v37 = vrot.slane %v581_v9, 5  ;;  %v1578_v61 = vld [vmem:[%s1942_s3 + $0x88] sm:$0xff]   ;;  %v1579_v0 = vld [vmem:[%s1942_s3 + $0x60] sm:$0xff]   ;;  %1444 = vmatpush3.bf16.msra.mxu0 %v1577_v60  ;;  %v1580_v1 = vld [vmem:[%s1942_s3 + $0xd0] sm:$0xff]  }
 0x10c   : >> { %682 = vst.msk [vmem:[#allocation3 + $0x38] sm:$0xf0] %vm564_vm11, %v618_v27  ;;  %v609_v38 = vor.u32 %v608_v28, %v605_v24  ;;  %v700_v39 = vshrl.u32 %v1369_v29, 16  ;;  %v703_v40 = vshll.u32 %v1369_v29, 16  ;;  %v666_v42 = vshll.u32 %v1368_v30, 16  ;;  %1468 = vmatpush3.bf16.msra.mxu1 %v1578_v61  ;;  %1445 = vmatprep.subr.bf16.mxu0 %v1579_v0  ;;  %v1582_v3 = vld [vmem:[%s1942_s3 + $0x90] sm:$0xff]  }
 0x10d   : >> { %598 = vst.msk [vmem:[#allocation3 + $0x10] sm:$0xf0] %vm564_vm11, %v596_v32  ;;  %v560_v43 = vor.u32 %v559_v33, %v555_v10  ;;  %v627_v44 = vshrl.u32 %v1365_v34, 16  ;;  %v630_v45 = vshll.u32 %v1365_v34, 16  ;;  %v516_v51 = vor.u32 %v515_v36, %v511_v2  ;;  %537 = vrot.lane.b32.xlu0 %v536_v15, %s1630_s25  ;;  %v1581_v2 = vld [vmem:[%s1942_s3 + $0x20] sm:$0xff]   ;;  %1469 = vmatprep.subr.bf16.mxu1 %v1580_v1  ;;  %v1583_v5 = vld [vmem:[%s1942_s3 + $0x68] sm:$0xff]  }
 0x10e   : >> { %679 = vst.msk [vmem:[#allocation3 + $0x30] sm:$0xf0] %vm564_vm11, %v609_v38  ;;  %v702_v48 = vrot.slane %v700_v39, 4  ;;  %v705_v49 = vrot.slane %v703_v40, 5  ;;  %v664_v52 = vshrl.u32 %v1368_v30, 16  ;;  %v668_v53 = vrot.slane %v666_v42, 1 }
 0x10f   : >> { %619 = vrot.lane.b32.xlu1 %v618_v27, %s1630_s25  ;;  %562 = vst.msk [vmem:[#allocation3 + $0x20] sm:$0xf] %vm340_vm10, %v560_v43  ;;  %v629_v54 = vrot.slane %v627_v44, 4  ;;  %v632_v55 = vrot.slane %v630_v45, 5  ;;  %518 = vst.msk [vmem:[#allocation3 + $0x8] sm:$0xf] %vm340_vm10, %v516_v51  ;;  %v584_v58 = vor.u32 %v583_v37, %v1776_v8  ;;  %1446 = vmatpush3.bf16.msra.mxu0 %v1581_v2 }
 0x110   : >> { %v706_v57 = vor.u32 %v705_v49, %v702_v48  ;;  %v669_v59 = vor.u32 %v668_v53, %v664_v52  ;;  %v689_v62 = vrot.slane %v664_v52, 4  ;;  %v690_v63 = vrot.slane %v666_v42, 5  ;;  %1470 = vmatpush3.bf16.msra.mxu1 %v1582_v3  ;;  %v1584_v6 = vld [vmem:[%s1942_s3 + $0xd8] sm:$0xff]   ;;  %1447 = vmatprep.subr.bf16.mxu0 %v1583_v5  ;;  %v1585_v7 = vld [vmem:[%s1942_s3 + $0x28] sm:$0xff]   ;;  %v1587_v9 = vld [vmem:[%s1942_s3 + $0x70] sm:$0xff]  }
 0x111   : >> { %v633_v56 = vor.u32 %v632_v55, %v629_v54  ;;  %586 = vst.msk [vmem:[#allocation3 + $0x8] sm:$0xf0] %vm564_vm11, %v584_v58  ;;  %641 = vrot.lane.b32.xlu0 %v1366_v47, %s1630_s25  ;;  %v1586_v8 = vld [vmem:[%s1942_s3 + $0x98] sm:$0xff]   ;;  %1471 = vmatprep.subr.bf16.mxu1 %v1584_v6  ;;  %v1588_v10 = vld [vmem:[%s1942_s3 + $0xe0] sm:$0xff]   ;;  %v1589_v11 = vld [vmem:[%s1942_s3 + $0x30] sm:$0xff]  }
 0x112   : >> { %708 = vst.msk [vmem:[#allocation3 + $0x48] sm:$0xf0] %vm564_vm11, %v706_v57  ;;  %v691_v4 = vor.u32 %v690_v63, %v689_v62  ;;  %v1590_v12 = vld [vmem:[%s1942_s3 + $0xa0] sm:$0xff]   ;;  %v1591_v13 = vld [vmem:[%s1942_s3 + $0x78] sm:$0xff]   ;;  %v1592_v14 = vld [vmem:[%s1942_s3 + $0xe8] sm:$0xff]  }
 0x113   : >> { %610 = vrot.lane.b32.xlu1 %v609_v38, %s1630_s25  ;;  %671 = vst.msk [vmem:[#allocation3 + $0x48] sm:$0xf] %vm340_vm10, %v669_v59  ;;  %1448 = vmatpush3.bf16.msra.mxu0 %v1585_v7  ;;  %v1593_v15 = vld [vmem:[%s1942_s3 + $0x38] sm:$0xff]   ;;  %v1594_v16 = vld [vmem:[%s1942_s3 + $0xa8] sm:$0xff]   ;;  %v1595_v17 = vld [vmem:[%s1942_s3 + $0xf0] sm:$0xff]  }
 0x114   : >> { %635 = vst.msk [vmem:[#allocation3 + $0x20] sm:$0xf0] %vm564_vm11, %v633_v56  ;;  %1472 = vmatpush3.bf16.msra.mxu1 %v1586_v8  ;;  %1449 = vmatprep.subr.bf16.mxu0 %v1587_v9  ;;  %v1596_v18 = vld [vmem:[%s1942_s3 + $0xb0] sm:$0xff]   ;;  %v1597_v19 = vld [vmem:[%s1942_s3 + $0xf8] sm:$0xff]   ;;  %v1598_v20 = vld [vmem:[%s1942_s3 + $0x100] sm:$0xff]  }
 0x115   : >> { %654 = vrot.lane.b32.xlu0 %v1789_v26, %s1630_s25  ;;  %1473 = vmatprep.subr.bf16.mxu1 %v1588_v10  ;;  %v1599_v21 = vld [vmem:[%s1942_s3 + $0xb8] sm:$0xff]   ;;  %v1600_v30 = vld [vmem:[%s1942_s3 + $0x108] sm:$0xff]   ;;  %v1601_v34 = vld [vmem:[%s1942_s3 + $0x110] sm:$0xff]  }
 0x116   : >> { %v1602_v38 = vld [vmem:[%s1942_s3 + $0x118] sm:$0xff]  }
 0x117   : >> { %674 = vrot.lane.b32.xlu1 %v596_v32, %s1630_s25  ;;  %1450 = vmatpush3.bf16.msra.mxu0 %v1589_v11 }
 0x118   : >> { %1474 = vmatpush3.bf16.msra.mxu1 %v1590_v12  ;;  %1451 = vmatprep.subr.bf16.mxu0 %v1591_v13 }
 0x119   : >> { %646 = vrot.lane.b32.xlu0 %v560_v43, %s1630_s25  ;;  %1475 = vmatprep.subr.bf16.mxu1 %v1592_v14 }
 0x11a   : >> { %v718_v47 = vld [vmem:[#allocation3 + $0x48] sm:$0xff] }
 0x11b   : >> { %692 = vrot.lane.b32.xlu1 %v691_v4, %s1630_s25  ;;  %1452 = vmatpush3.bf16.msra.mxu0 %v1593_v15  ;;  %v713_v43 = vld [vmem:[#allocation3 + $0x20] sm:$0xff] }
 0x11c   : >> { %1476 = vmatpush3.bf16.msra.mxu1 %v1594_v16  ;;  %1511 = vmatprep.subr.bf16.mxu0 %v1598_v20 }
 0x11d   : >> { %1477 = vmatprep.subr.bf16.mxu1 %v1595_v17 }
 0x11f   : >> { %683 = vrot.lane.b32.xlu1 %v633_v56, %s1630_s25 }
 0x120   : >> { %1478 = vmatpush3.bf16.msra.mxu1 %v1596_v18 }
 0x121   : >> { %1479 = vmatprep.subr.bf16.mxu1 %v1597_v19 }
 0x124   : >> { %1480 = vmatpush3.bf16.msra.mxu1 %v1599_v21 }
 0x173   : >> { %v523_v22 = vpop.permute.xlu0 %522  ;;  %v501_v23 = vpop.permute.xlu1 %500 }
 0x174   : >> { %525 = vst.msk [vmem:[#allocation3 + $0x8] sm:$0xf] %vm503_vm12, %v523_v22  ;;  %504 = vst.msk [vmem:[#allocation3] sm:$0xf] %vm503_vm12, %v501_v23  ;;  %v1408_v23 = vld [vmem:[%s1943_s4] ss:$0 sm:$0xff] }
 0x177   : >> { %v591_v24 = vpop.permute.xlu0 %590 }
 0x178   : >> { %593 = vst.msk [vmem:[#allocation3 + $0x8] sm:$0xf0] %vm572_vm13, %v591_v24 }
 0x179   : >> { %637 = vst.msk [vmem:[#allocation3 + $0x28] sm:$0xf] %vm503_vm12, %v591_v24 }
 0x17b   : >> { %v546_v26 = vpop.permute.xlu0 %545 }
 0x17c   : >> { %548 = vst.msk [vmem:[#allocation3 + $0x18] sm:$0xf] %vm503_vm12, %v546_v26 }
 0x17d   : >> { %v570_v25 = vpop.permute.xlu1 %569  ;;  %680 = vst.msk [vmem:[#allocation3 + $0x30] sm:$0xf0] %vm572_vm13, %v546_v26 }
 0x17e   : >> { %573 = vst.msk [vmem:[#allocation3] sm:$0xf0] %vm572_vm13, %v570_v25 }
 0x17f   : >> { %v538_v28 = vpop.permute.xlu0 %537  ;;  %v710_v29 = vld [vmem:[#allocation3 + $0x8] sm:$0xff] }
 0x180   : >> { %540 = vst.msk [vmem:[#allocation3 + $0x10] sm:$0xf] %vm503_vm12, %v538_v28  ;;  %1046 = vmatprep.mubr.bf16.mxu0 %v710_v29 }
 0x181   : >> { %v620_v27 = vpop.permute.xlu1 %619 }
 0x182   : >> { %622 = vst.msk [vmem:[#allocation3 + $0x18] sm:$0xf0] %vm572_vm13, %v620_v27 }
 0x183   : >> { %v642_v33 = vpop.permute.xlu0 %641 }
 0x184   : >> { %644 = vst.msk [vmem:[#allocation3 + $0x30] sm:$0xf] %vm503_vm12, %v642_v33 }
 0x185   : >> { %v611_v31 = vpop.permute.xlu1 %610  ;;  %v709_v32 = vld [vmem:[#allocation3] sm:$0xff] }
 0x186   : >> { %613 = vst.msk [vmem:[#allocation3 + $0x10] sm:$0xf0] %vm572_vm13, %v611_v31  ;;  %1047 = vmatmul.mubr.bf16.vlgmr.msra.gmra.mrb[0].mxu0 %v709_v32 }
 0x187   : >> { %1512 = vmatpush3.bf16.msra.mxu0 %v1598_v20  ;;  %v655_v37 = vpop.permute.xlu0 %654 }
 0x188   : >> { %1513 = vmatprep.subr.bf16.mxu0 %v1600_v30  ;;  %657 = vst.msk [vmem:[#allocation3 + $0x40] sm:$0xf] %vm503_vm12, %v655_v37 }
 0x189   : >> { %v675_v35 = vpop.permute.xlu1 %674  ;;  %v712_v36 = vld [vmem:[#allocation3 + $0x18] sm:$0xff] }
 0x18a   : >> { %677 = vst.msk [vmem:[#allocation3 + $0x28] sm:$0xf0] %vm572_vm13, %v675_v35  ;;  %1095 = vmatprep.mubr.bf16.mxu1 %v712_v36 }
 0x18b   : >> { %1514 = vmatpush3.bf16.msra.mxu0 %v1600_v30  ;;  %v715_v41 = vld [vmem:[#allocation3 + $0x30] sm:$0xff]  ;;  %v647_v42 = vpop.permute.xlu0 %646 }
 0x18c   : >> { %1515 = vmatprep.subr.bf16.mxu0 %v1601_v34  ;;  %1054 = vmatprep.mubr.bf16.mxu0 %v715_v41  ;;  %649 = vst.msk [vmem:[#allocation3 + $0x38] sm:$0xf] %vm503_vm12, %v647_v42 }
 0x18d   : >> { %v693_v39 = vpop.permute.xlu1 %692  ;;  %v711_v40 = vld [vmem:[#allocation3 + $0x10] sm:$0xff] }
 0x18e   : >> { %695 = vst.msk [vmem:[#allocation3 + $0x40] sm:$0xf0] %vm572_vm13, %v693_v39  ;;  %1096 = vmatmul.mubr.bf16.vlgmr.msra.gmra.mrb[0].mxu1 %v711_v40 }
 0x18f   : >> { %1516 = vmatpush3.bf16.msra.mxu0 %v1601_v34 }
 0x190   : >> { %1517 = vmatprep.subr.bf16.mxu0 %v1602_v38 }
 0x191   : >> { %v684_v44 = vpop.permute.xlu1 %683  ;;  %v714_v45 = vld [vmem:[#allocation3 + $0x28] sm:$0xff] }
 0x192   : >> { %686 = vst.msk [vmem:[#allocation3 + $0x38] sm:$0xf0] %vm572_vm13, %v684_v44  ;;  %1055 = vmatmul.mubr.bf16.gmra.mrb[4].mxu0 %v714_v45 }
 0x193   : >> { %1518 = vmatpush3.bf16.msra.mxu0 %v1602_v38  ;;  %1519 = vmatprep.mubr.msk.bf16.mxu0 %vm1007_vm14, %v713_v43 }
 0x195   : >> { %v717_v46 = vld [vmem:[#allocation3 + $0x40] sm:$0xff] }
 0x196   : >> { %1103 = vmatprep.mubr.bf16.mxu1 %v717_v46 }
 0x199   : >> { %v716_v48 = vld [vmem:[#allocation3 + $0x38] sm:$0xff] }
 0x19a   : >> { %1104 = vmatmul.mubr.bf16.gmra.mrb[4].mxu1 %v716_v48  ;;  %1520 = vmatmul.mubr.msk.bf16.vlgmr.msra.gmra.mrb[8].mxu0 %vm1007_vm14, %v718_v47 }
 0x259   : >> { %v1453_v49 = vpop.f32.mrb[0].mxu0 }
 0x25a   : >> { %v1454_v50 = vpop.f32.mrb[1].mxu0 }
 0x25b   : >> { %v1455_v51 = vadd.f32 %v1454_v50, %v1453_v49  ;;  %v1456_v52 = vpop.f32.mrb[2].mxu0 }
 0x25c   : >> { %v1457_v53 = vpop.f32.mrb[3].mxu0 }
 0x25d   : >> { %v1458_v54 = vadd.f32 %v1457_v53, %v1456_v52 }
 0x261   : >> { %v1481_v55 = vpop.f32.mrb[0].mxu1 }
 0x262   : >> { %v1482_v57 = vpop.f32.mrb[1].mxu1 }
 0x263   : >> { %v1483_v58 = vadd.f32 %v1482_v57, %v1481_v55  ;;  %v1484_v59 = vpop.f32.mrb[2].mxu1 }
 0x264   : >> { %v1485_v56 = vpop.f32.mrb[3].mxu1 }
 0x265   : >> { %v1486_v60 = vadd.f32 %v1485_v56, %v1484_v59  ;;  %v1459_v61 = vpop.f32.mrb[4].mxu0  ;;  %v1098_v62 = vadd.f32 %v1483_v58, %v1455_v51 }
 0x266   : >> { %v1460_v63 = vpop.f32.mrb[5].mxu0 }
 0x267   : >> { %v1461_v0 = vadd.f32 %v1460_v63, %v1459_v61  ;;  %v1462_v1 = vpop.f32.mrb[6].mxu0  ;;  %v1101_v2 = vadd.f32 %v1486_v60, %v1458_v54 }
 0x268   : >> { %v1463_v3 = vpop.f32.mrb[7].mxu0 }
 0x269   : >> { %v1464_v4 = vadd.f32 %v1463_v3, %v1462_v1 }
 0x26d   : >> { %v1487_v5 = vpop.f32.mrb[4].mxu1  ;;  %v1521_v6 = vpop.f32.mrb[8].mxu0 }
 0x26e   : >> { %v1488_v7 = vpop.f32.mrb[5].mxu1  ;;  %v1146_v8 = vpop.f32.mrb[9].mxu0 }
 0x26f   : >> { %v1489_v9 = vadd.f32 %v1488_v7, %v1487_v5  ;;  %v1147_v10 = vadd.f32 %v1146_v8, %v1098_v62  ;;  %v1490_v11 = vpop.f32.mrb[6].mxu1  ;;  %v1522_v12 = vpop.f32.mrb[10].mxu0 }
 0x270   : >> { %v1491_v13 = vpop.f32.mrb[7].mxu1  ;;  %v1149_v14 = vpop.f32.mrb[11].mxu0 }
 0x271   : >> { %v1106_v15 = vadd.f32 %v1489_v9, %v1461_v0  ;;  %v1492_v16 = vadd.f32 %v1491_v13, %v1490_v11  ;;  %v1150_v17 = vadd.f32 %v1149_v14, %v1101_v2 }
 0x273   : >> { %v1155_v18 = vadd.f32 %v1521_v6, %v1106_v15  ;;  %v1109_v19 = vadd.f32 %v1492_v16, %v1464_v4  ;;  %v1161_v20 = vmax.f32 %v1147_v10, %v1150_v17 }
 0x275   : >> { %v1158_v21 = vadd.f32 %v1522_v12, %v1109_v19 }
 0x277   : >> { %v1162_v22 = vmax.f32 %v1155_v18, %v1158_v21 }
 0x279   : >> { %v1163_v24 = vmax.f32 %v1161_v20, %v1162_v22  ;;  %449 = sbr.rel (!%p447_p8) target bundleno = 248 (0xf8), region = 108 }
 0x27b   : >> { %v1171_v25 = vadd.f32 %v1408_v23, %v1163_v24 }
 0x27d   : >> { %v1172_v26 = vmax.f32 %v1171_v25, 0.0 }
 0x27f   : >> { %1176 = vst.msk [vmem:[%s1174_s6] sm:$0xff] %vm1175_vm15, %v1172_v26 }
 0x280 PF: > { %s15_s18 = sadd.s32 1, %s1617_s18  }
 0x281   : > { %p12_p9 = scmp.ge.s32.totalorder %s15_s18, 4  }
 0x283   :  { %14 = sbr.rel (!%p12_p9) target bundleno = 1 (0x1), region = 119 }

// kernel: simple_cnn_forward.3
= control target key start
LH: loop header
LB: loop body
LE: loop exit
PB: predicated region body
PF: predicated region fallthrough
CT: control target
= control target key end

     0   :  { %8 = vsyncpa [#allocation3], 0  ;;  %s589_s12 = smov 0   ;;  %s658_s0 = inlined_call_operand.vmem [shape: bf16[2,2048], index: 0, kind: input, shape index: {}]   ;;  %s659_s1 = inlined_call_operand.vmem [shape: bf16[2048,2], index: 1, kind: input, shape index: {}]   ;;  %s660_s2 = inlined_call_operand.vmem [shape: f32[1,2], index: 2, kind: input, shape index: {}]   ;;  %s661_s3 = inlined_call_operand.hbm [shape: f32[2,2], index: 3, kind: output, shape index: {}]  }
   0x1 LB: > { %s595_s13 = sadd.s32 4294967295, %s565_s12   ;;  %p448_p0 = scmp.ge.s32.totalorder %s565_s12, 1  ;;  %s565_s12 = sphi %s589_s12, %s14_s12  }
   0x2   : > { %p144_p1 = scmp.lt.s32.totalorder %s565_s12, 9 }
   0x4   : > { %p145_p2 = pnand %p448_p0, %p144_p1 }
   0x5   : > { %s449_s14 = sshll.u32 (!%p145_p2), %s595_s13, 1  ;;  %s450_s15 = sshll.u32 (!%p145_p2), %s595_s13, 5 }
   0x6   : > { %148 = sbr.rel (%p145_p2) target bundleno = 287 (0x11f), region = 32  ;;  %p168_p3 = scmp.lt.s32.totalorder (!%p145_p2), %s449_s14, 15 }
   0x7   : > { %p173_p4 = scmp.lt.s32.totalorder (!%p145_p2), %s450_s15, 255  ;;  %p452_p5 = scmp.ne.s32.totalorder (!%p145_p2), %s595_s13, 0 }
   0xd   : > { %s663_s14 = smov (!%p168_p3, %s449_s14), 15  ;;  %s665_s15 = smov (!%p173_p4, %s450_s15), 255 }
   0xe   : > { %s170_s18 = scalar_lea.vmem %s658_s0, %s663_s14  ;;  %s451_s19 = sshll.u32 %s665_s15, 2  ;;  %v453_v0 = vld [vmem:[%s660_s2] ss:$0 sm:$0xff] (!%p452_p5)  ;;  %vm190_vm0 = vcmask (!%p452_p5), 9216  }
   0xf   : > { %s610_s22 = scalar_lea.vmem %s659_s1, %s451_s19  ;;  %182 = sbr.rel (%p452_p5) target bundleno = 22 (0x16), region = 36  ;;  %191 = vst.msk [vmem:[#allocation2] sm:$0x3] (!%p452_p5), %vm190_vm0, %v453_v0 }
  0x16 PF: > { %v513_v1 = vld [vmem:[%s610_s22 + $0x40] sm:$0xff]   ;;  %v515_v3 = vld [vmem:[%s610_s22 + $0x48] sm:$0xff]   ;;  %v517_v5 = vld [vmem:[%s610_s22 + $0x50] sm:$0xff]   ;;  %v238_v10 = vlaneseq  ;;  %v567_v14 = vmov 1966171168   ;;  %s568_s25 = smov [#allocation2]  }
  0x17   : > { %v514_v2 = vld [vmem:[%s610_s22] sm:$0xff]   ;;  %475 = vmatprep.subr.bf16.mxu0 %v513_v1  ;;  %v516_v4 = vld [vmem:[%s610_s22 + $0x8] sm:$0xff]   ;;  %v518_v6 = vld [vmem:[%s610_s22 + $0x10] sm:$0xff]   ;;  %v236_v15 = vunpack.c.l.s4 %v567_v14  ;;  %s397_s26 = sshll.u32 %s568_s25, 4  ;;  %vm388_vm1 = vcmask 9216   ;;  %p501_p6 = scmp.eq.s32.totalorder %s595_s13, 7  ;;  %s398_s26 = int_to_ptr.vmem [resolvable:$true] %s397_s26 }
  0x18   : > { %476 = vmatpush3.bf16.msra.mxu0 %v514_v2  ;;  %v519_v7 = vld [vmem:[%s610_s22 + $0x58] sm:$0xff]   ;;  %v521_v9 = vld [vmem:[%s610_s22 + $0x60] sm:$0xff]   ;;  %v523_v12 = vld [vmem:[%s610_s22 + $0x68] sm:$0xff]   ;;  %v239_v16 = vshrl.u32 %v238_v10, 7  ;;  %s529_s27 = scalar_lea.vmem %s398_s26, 32  ;;  %p536_p10 = scmp.lt.s32.totalorder %s398_s26, %s398_s26 }
  0x19   : > { %477 = vmatprep.subr.bf16.mxu0 %v515_v3  ;;  %v520_v8 = vld [vmem:[%s610_s22 + $0x18] sm:$0xff]   ;;  %v522_v11 = vld [vmem:[%s610_s22 + $0x20] sm:$0xff]   ;;  %v524_v17 = vld [vmem:[%s610_s22 + $0x28] sm:$0xff]   ;;  %v237_v19 = vunpack.c.0.s8 %v236_v15  ;;  %p530_p7 = scmp.ne.s32.totalorder %s398_s26, %s529_s27  ;;  %p537_p11 = scmp.lt.s32.totalorder %s529_s27, %s529_s27 }
  0x1a   : > { %v454_v13 = vld.sshfl [vmem:[%s170_s18] sm:$0x11 pattern:$0x75316420]  ;;  %v525_v20 = vld [vmem:[%s610_s22 + $0x70] sm:$0xff]   ;;  %v527_v24 = vld [vmem:[%s610_s22 + $0x78] sm:$0xff]  }
  0x1b   : > { %v234_v18 = vcombine.high %v454_v13, %v454_v13  ;;  %v240_v21 = vsub.s32 %v237_v19, %v239_v16  ;;  %v526_v22 = vld [vmem:[%s610_s22 + $0x30] sm:$0xff]   ;;  %v528_v25 = vld [vmem:[%s610_s22 + $0x38] sm:$0xff]   ;;  %v192_v28 = vld [vmem:[#allocation2] sm:$0x3]  ;;  %p531_p8 = pnand %p530_p7, %p501_p6  ;;  %p538_p12 = por %p537_p11, %p536_p10 }
  0x1c   : > { %478 = vmatpush3.bf16.msra.mxu0 %v516_v4 }
  0x1d   : > { %479 = vmatprep.subr.bf16.mxu0 %v517_v5  ;;  %v248_v23 = vrot.slane %v234_v18, %v240_v21  ;;  %v241_v26 = vrot.slane %v454_v13, %v240_v21  ;;  %p532_p9 = pneg %p531_p8 }
  0x1f   : > { %379 = vmatprep.mubr.bf16.mxu0 %v248_v23  ;;  %p539_p13 = pnand %p538_p12, %p532_p9 }
  0x20   : > { %480 = vmatpush3.bf16.msra.mxu0 %v518_v6 }
  0x21   : > { %481 = vmatprep.subr.bf16.mxu0 %v519_v7 }
  0x24   : > { %482 = vmatpush3.bf16.msra.mxu0 %v520_v8 }
  0x25   : > { %483 = vmatprep.subr.bf16.mxu0 %v521_v9 }
  0x28   : > { %484 = vmatpush3.bf16.msra.mxu0 %v522_v11 }
  0x29   : > { %485 = vmatprep.subr.bf16.mxu0 %v523_v12 }
  0x2c   : > { %486 = vmatpush3.bf16.msra.mxu0 %v524_v17 }
  0x2d   : > { %487 = vmatprep.subr.bf16.mxu0 %v525_v20 }
  0x30   : > { %488 = vmatpush3.bf16.msra.mxu0 %v526_v22 }
  0x31   : > { %489 = vmatprep.subr.bf16.mxu0 %v527_v24 }
  0x34   : > { %490 = vmatpush3.bf16.msra.mxu0 %v528_v25 }
  0x37   : > { %380 = vmatmul.mubr.bf16.vlgmr.msra.gmra.mrb[0].mxu0 %v241_v26 }
 0x10a   : > { %v491_v27 = vpop.f32.mrb[0].mxu0 }
 0x10b   : > { %v492_v29 = vpop.f32.mrb[1].mxu0 }
 0x10c   : > { %v493_v30 = vadd.f32 %v492_v29, %v491_v27  ;;  %v494_v31 = vpop.f32.mrb[2].mxu0 }
 0x10d   : > { %v495_v32 = vpop.f32.mrb[3].mxu0 }
 0x10e   : > { %v387_v33 = vadd.f32 %v493_v30, %v192_v28 }
 0x110   : > { %389 = vst.msk [vmem:[#allocation2] sm:$0x3] %vm388_vm1, %v387_v33 }
 0x111   : > { %542 = shalt.err (!%p539_p13)
}
 0x112   : > { %s543_s30 = scalar_lea.hbm %s661_s3, 32 }
 0x113   : > { %p544_p0 = scmp.ne.s32.totalorder %s661_s3, %s543_s30  ;;  %p549_p3 = scmp.lt.u32.totalorder %s543_s30, %s661_s3 }
 0x115   : > { %p545_p1 = pnand %p544_p0, %p501_p6 }
 0x117   : > { %p546_p2 = pneg %p545_p1 }
 0x119   : > { %p551_p4 = pnand %p549_p3, %p546_p2 }
 0x11b   : > { %554 = shalt.err (!%p551_p4)
}
 0x11c   : > { %498 = dma.vmem_to_hbm [thread:$0]  (%p501_p6), %s398_s26, 32, %s661_s3, [#allocation3]  }
 0x11d   : > { %560 = dma.done.wait (%p501_p6), [#allocation3], 32  }
 0x11e   : > { %562 = vsyncadd (%p501_p6), [#allocation3], 4294967264 }
 0x11f PF: > { %s14_s12 = sadd.s32 1, %s565_s12  }
 0x120   : > { %p11_p5 = scmp.ge.s32.totalorder %s14_s12, 10  }
 0x122   :  { %13 = sbr.rel (!%p11_p5) target bundleno = 1 (0x1), region = 66 }
 0x129   :  { %410 = vsyncpa [#allocation3], 1 }
 0x12a   :  { %412 = vsyncpa [#allocation3 + $0x1], 1 }

</bundles_post_ra>
